<compile_context>
chip_gen: v5e
topology: v5e:2x2
jax: 0.10.0
libtpu: 0.0.40
codegen_flags: <defaults>
</compile_context>

<pallas_src>
import functools

import jax
import jax.numpy as jnp
from jax.experimental import pallas as pl
from jax.experimental.pallas import tpu as pltpu


def _round_up(x, m):
    return (x + m - 1) // m * m


def _vmem_capacity_bytes():
    try:
        return int(pltpu.get_tpu_info().vmem_capacity_bytes)
    except Exception:
        return 64 * 1024 * 1024  # conservative (v7x physical VMEM per core)


def _has_bf16_eup():
    """True on chips with a bf16 EUP/VPU path (v6e, v7x)."""
    try:
        kind = jax.devices()[0].device_kind.lower()
    except Exception:
        return False
    return not any(old in kind for old in ("v2", "v3", "v4", "v5"))


# ---------------------------------------------------------------------------
# Fused kernel: LN(q tile), LN(full K) once per batch, softmax(qn @ kn^T) @ V
# ---------------------------------------------------------------------------

def _qk_prenorm_attn_kernel(q_ref, k_ref, v_ref, g_ref, b_ref, o_ref, kn_ref, *,
                            scale, eps, mm_dtype, exp_dtype, exact):
    g = g_ref[...].astype(jnp.float32)        # (1, D)
    bta = b_ref[...].astype(jnp.float32)      # (1, D)

    def layernorm(x):                         # statistics always in f32
        xf = x.astype(jnp.float32)
        mu = jnp.mean(xf, axis=-1, keepdims=True)
        xc = xf - mu
        var = jnp.mean(xc * xc, axis=-1, keepdims=True)
        return xc * jax.lax.rsqrt(var + eps) * g + bta

    # LN(K) is hoisted: recomputed only at the start of every (batch, qo) block
    # and reused (VMEM scratch) for all q tiles along the "arbitrary" qi axis.
    @pl.when(pl.program_id(2) == 0)
    def _():
        kn_ref[...] = layernorm(k_ref[...]).astype(kn_ref.dtype)      # (Nk, D)

    # Fold the attention scale into q (tq*D elems instead of tq*Nk).
    qn = (layernorm(q_ref[...]) * scale).astype(mm_dtype)             # (tq, D)

    s = jax.lax.dot_general(qn, kn_ref[...], (((1,), (1,)), ((), ())),
                            preferred_element_type=jnp.float32)       # (tq, Nk) f32
    m = jnp.max(s, axis=-1, keepdims=True)
    p = jnp.exp((s - m).astype(exp_dtype))                            # bf16 on v6e/v7x
    l = jnp.sum(p, axis=-1, keepdims=True, dtype=jnp.float32)
    pv = jnp.dot(p.astype(mm_dtype), v_ref[...].astype(mm_dtype),
                 preferred_element_type=jnp.float32)                  # (tq, Dv) f32
    inv = (1.0 / l) if exact else pl.reciprocal(l, approx=True)
    o_ref[...] = (pv * inv).astype(o_ref.dtype)


def qk_prenorm_attention(q, k, v, gamma, beta, *, scale, eps=1e-5, tq=512,
                         precise=False, out_dtype=None):
    """Fused QKPreNorm + cross-attention:  softmax(LN(q) @ LN(k)^T * scale) @ v.

    q: (B, Nq, D), k: (B, Nk, D), v: (B, Nk, Dv)  ->  (B, Nq, Dv).
    """
    B, Nq, D = q.shape
    _, Nk, Dv = v.shape
    assert k.shape == (B, Nk, D)
    out_dtype = v.dtype if out_dtype is None else out_dtype
    scale = float(scale)

    if precise:
        mm_dtype = q.dtype if q.dtype != jnp.float64 else jnp.float32
        exp_dtype = jnp.float32
    else:
        mm_dtype = jnp.bfloat16
        exp_dtype = jnp.bfloat16 if _has_bf16_eup() else jnp.float32

    b_in = jnp.dtype(q.dtype).itemsize
    b_v = jnp.dtype(v.dtype).itemsize
    b_mm = jnp.dtype(mm_dtype).itemsize
    b_exp = jnp.dtype(exp_dtype).itemsize
    b_out = jnp.dtype(out_dtype).itemsize

    def footprint(tq_):
        kv = 2 * Nk * D * b_in            # K block (double-buffered by pipeline)
        vv = 2 * Nk * Dv * b_v            # V block (double-buffered)
        qq = 2 * tq_ * D * b_in           # q tile
        oo = 2 * tq_ * Dv * b_out         # output tile
        kn = Nk * D * b_mm                # LN(K) scratch (single)
        s_ = tq_ * Nk * 4                 # f32 score slab
        p_ = tq_ * Nk * b_exp             # softmax numerator slab
        tmp = tq_ * Nk * max(4, b_mm) + (tq_ + Nk) * D * 4   # casts / LN temps
        return kv + vv + qq + oo + kn + s_ + p_ + tmp

    cap = _vmem_capacity_bytes()
    budget = int(cap * 0.7)
    tq = min(int(tq), _round_up(Nq, 8))
    tq = max(8, tq // 8 * 8)
    while footprint(tq) > budget and tq > 8:
        tq = max(8, (tq // 2) // 8 * 8)

    if footprint(tq) > budget:
        # Full K/V residency does not fit VMEM on this chip.
        # TODO(synk): add an Nk-tiled online-softmax variant of the fused kernel.
        qn = layernorm(q, gamma, beta, eps=eps)
        kn = layernorm(k, gamma, beta, eps=eps)
        s = jnp.einsum('bqd,bkd->bqk', qn, kn,
                       preferred_element_type=jnp.float32) * scale
        p = jax.nn.softmax(s, axis=-1)
        return jnp.einsum('bqk,bkd->bqd', p.astype(v.dtype), v,
                          preferred_element_type=jnp.float32).astype(out_dtype)

    # --- grid layout: (B, qo "parallel", qi "arbitrary") -------------------
    Nq_pad = _round_up(Nq, tq)
    nq_tiles = Nq_pad // tq
    n_qo = 1
    if B == 1 and nq_tiles >= 2:          # keep both TensorCores busy on v7x
        if nq_tiles % 2:
            Nq_pad += tq
            nq_tiles += 1
        n_qo = 2
    n_qi = nq_tiles // n_qo

    q_p = q if Nq_pad == Nq else jnp.pad(q, ((0, 0), (0, Nq_pad - Nq), (0, 0)))

    vmem_limit = int(min(cap * 0.9,
                         max(32 * 1024 * 1024, footprint(tq) + 16 * 1024 * 1024)))

    # TODO(synk): no K-token masking is applied; if the wrapped correlation
    # module masks padded K tokens, pass fn explicitly (generic path).
    out = pl.pallas_call(
        functools.partial(_qk_prenorm_attn_kernel, scale=scale, eps=eps,
                          mm_dtype=mm_dtype, exp_dtype=exp_dtype, exact=precise),
        out_shape=jax.ShapeDtypeStruct((B, Nq_pad, Dv), out_dtype),
        grid_spec=pltpu.PrefetchScalarGridSpec(
            num_scalar_prefetch=0,
            grid=(B, n_qo, n_qi),
            in_specs=[
                pl.BlockSpec((pl.Squeezed(), tq, D),
                             lambda b, qo, qi: (b, qo * n_qi + qi, 0)),   # q tile
                pl.BlockSpec((pl.Squeezed(), Nk, D),
                             lambda b, qo, qi: (b, 0, 0)),                # full K
                pl.BlockSpec((pl.Squeezed(), Nk, Dv),
                             lambda b, qo, qi: (b, 0, 0)),                # full V
                pl.BlockSpec((1, D), lambda b, qo, qi: (0, 0)),           # gamma
                pl.BlockSpec((1, D), lambda b, qo, qi: (0, 0)),           # beta
            ],
            out_specs=pl.BlockSpec((pl.Squeezed(), tq, Dv),
                                   lambda b, qo, qi: (b, qo * n_qi + qi, 0)),
            scratch_shapes=[pltpu.VMEM((Nk, D), mm_dtype)],               # LN(K)
        ),
        compiler_params=pltpu.CompilerParams(
            dimension_semantics=("parallel", "parallel", "arbitrary"),
            vmem_limit_bytes=vmem_limit),
    )(q_p, k, v, gamma.reshape(1, D), beta.reshape(1, D))

    return out[:, :Nq] if Nq_pad != Nq else out


# ---------------------------------------------------------------------------
# Generic path: row LayerNorm kernel (arbitrary fn runs outside)
# ---------------------------------------------------------------------------

def _layernorm_kernel(x_ref, g_ref, b_ref, o_ref, *, eps):
    g = g_ref[...].astype(jnp.float32)
    bta = b_ref[...].astype(jnp.float32)
    xf = x_ref[...].astype(jnp.float32)
    mu = jnp.mean(xf, axis=-1, keepdims=True)
    xc = xf - mu
    var = jnp.mean(xc * xc, axis=-1, keepdims=True)
    o_ref[...] = (xc * jax.lax.rsqrt(var + eps) * g + bta).astype(o_ref.dtype)


def layernorm(x, gamma, beta, *, eps=1e-5, tm=1024):
    """LayerNorm over the last dim for any leading shape (memory-bound helper).

    TODO(synk): for D << 128 the loads/stores are lane-sparse; a 128/D row
    packing would recover bandwidth, but the win is marginal vs. the fused path.
    """
    shape = x.shape
    D = shape[-1]
    xf = x.reshape(-1, D)
    M = xf.shape[0]
    tm = max(8, min(int(tm), _round_up(M, 8)) // 8 * 8)
    Mp = _round_up(M, tm)
    if Mp != M:
        xf = jnp.pad(xf, ((0, Mp - M), (0, 0)))

    out = pl.pallas_call(
        functools.partial(_layernorm_kernel, eps=eps),
        out_shape=jax.ShapeDtypeStruct((Mp, D), x.dtype),
        grid_spec=pltpu.PrefetchScalarGridSpec(
            num_scalar_prefetch=0,
            grid=(Mp // tm,),
            in_specs=[pl.BlockSpec((tm, D), lambda i: (i, 0)),
                      pl.BlockSpec((1, D), lambda i: (0, 0)),
                      pl.BlockSpec((1, D), lambda i: (0, 0))],
            out_specs=pl.BlockSpec((tm, D), lambda i: (i, 0))),
        compiler_params=pltpu.CompilerParams(dimension_semantics=("parallel",)),
    )(xf, gamma.reshape(1, D), beta.reshape(1, D))
    if Mp != M:
        out = out[:M]
    return out.reshape(shape)


# ---------------------------------------------------------------------------
# QKPreNorm.forward equivalent
# ---------------------------------------------------------------------------

def qk_prenorm_forward(gamma, beta, q, k, v=None, img=None, *, fn=None,
                       scale=None, eps=1e-5, precise=False, **kwargs):
    """Pallas equivalent of QKPreNorm.forward:  fn(LN(q), LN(k), v, img, **kwargs).

    fn=None selects the fused fast path where fn is QK cross-attention
    (softmax(q @ k^T * scale) @ v) with both LayerNorms fused into the kernel.
    Any other fn runs after the LayerNorm kernel (Nq != Nk supported).
    """
    if fn is None:
        assert v is not None
        if scale is None:
            scale = q.shape[-1] ** -0.5
        # TODO(synk): the fused fast path ignores `img` / extra kwargs — its
        # built-in fn is plain QK cross-attention; pass fn explicitly otherwise.
        return qk_prenorm_attention(q, k, v, gamma, beta, scale=scale, eps=eps,
                                    precise=precise)
    return fn(layernorm(q, gamma, beta, eps=eps),
              layernorm(k, gamma, beta, eps=eps), v, img, **kwargs)


# ---------------------------------------------------------------------------

if __name__ == "__main__":
    key = jax.random.PRNGKey(0)
    B, Nq, Nk, D, Dv = 2, 128, 128, 32, 16
    kq, kk, kv, kg, kb = jax.random.split(key, 5)
    q = jax.random.normal(kq, (B, Nq, D), jnp.float32)
    k = jax.random.normal(kk, (B, Nk, D), jnp.float32)
    v = jax.random.normal(kv, (B, Nk, Dv), jnp.float32)
    gamma = 1.0 + 0.1 * jax.random.normal(kg, (D,), jnp.float32)
    beta = 0.1 * jax.random.normal(kb, (D,), jnp.float32)
    img = jnp.zeros((B, 3, 16, 16), jnp.float32)   # forwarded by QKPreNorm, unused by fn
    scale = D ** -0.5

    # fused fast path (fn = QK cross-attention), throughput mode
    out = jax.block_until_ready(qk_prenorm_forward(gamma, beta, q, k, v, img, scale=scale))
    assert out.shape == (B, Nq, Dv)

    # fused fast path, accuracy mode (f32 operands / f32 exp / exact reciprocal)
    out_precise = jax.block_until_ready(
        qk_prenorm_forward(gamma, beta, q, k, v, img, scale=scale, precise=True))

    # generic path: LayerNorm kernel + user fn
    qn2, kn2 = qk_prenorm_forward(gamma, beta, q, k, v, img,
                                  fn=lambda qn, kn, v_, img_: (qn, kn))
    jax.block_until_ready((qn2, kn2))

    # pure-JAX reference
    def ln_ref(x):
        mu = x.mean(-1, keepdims=True)
        xc = x - mu
        var = (xc * xc).mean(-1, keepdims=True)
        return xc * jax.lax.rsqrt(var + 1e-5) * gamma + beta

    qn_ref, kn_ref = ln_ref(q), ln_ref(k)
    s_ref = jnp.einsum('bqd,bkd->bqk', qn_ref, kn_ref,
                       precision=jax.lax.Precision.HIGHEST) * scale
    ref = jnp.einsum('bqk,bkd->bqd', jax.nn.softmax(s_ref, axis=-1), v,
                     precision=jax.lax.Precision.HIGHEST)

    assert jnp.allclose(qn2, qn_ref, rtol=1e-4, atol=1e-4)
    assert jnp.allclose(kn2, kn_ref, rtol=1e-4, atol=1e-4)
    assert jnp.allclose(out_precise, ref, rtol=5e-3, atol=5e-3)
    assert jnp.allclose(out, ref, rtol=5e-2, atol=5e-2)   # bf16 MXU/exp + approx recip

    print("KERNEL_OK")
</pallas_src>

<mosaic_0001>
module attributes {stable_mosaic.version = 11 : i64} {
  func.func @_qk_prenorm_attn_kernel(%arg0: i32, %arg1: i32, %arg2: i32, %arg3: memref<1x128x32xf32, #tpu.memory_space<vmem>>, %arg4: memref<1x128x32xf32, #tpu.memory_space<vmem>>, %arg5: memref<1x128x16xf32, #tpu.memory_space<vmem>>, %arg6: memref<1x32xf32, #tpu.memory_space<vmem>>, %arg7: memref<1x32xf32, #tpu.memory_space<vmem>>, %arg8: memref<1x128x16xf32, #tpu.memory_space<vmem>>, %arg9: memref<128x32xbf16, #tpu.memory_space<vmem>>) attributes {dimension_semantics = [#tpu.dimension_semantics<parallel>, #tpu.dimension_semantics<parallel>, #tpu.dimension_semantics<arbitrary>], iteration_bounds = array<i64: 2, 1, 1>, scalar_prefetch = 0 : i64, scratch_operands = 1 : i64, tpu.core_type = #tpu.core_type<tc>, window_params = [{transform_indices = @transform_0, window_bounds = array<i64: 1, 128, 32>}, {transform_indices = @transform_1, window_bounds = array<i64: 1, 128, 32>}, {transform_indices = @transform_2, window_bounds = array<i64: 1, 128, 16>}, {pipeline_mode = #tpu.pipeline_mode<synchronous>, transform_indices = @transform_3, window_bounds = array<i64: 1, 32>}, {pipeline_mode = #tpu.pipeline_mode<synchronous>, transform_indices = @transform_4, window_bounds = array<i64: 1, 32>}, {transform_indices = @transform_5, window_bounds = array<i64: 1, 128, 16>}]} {
    %c0 = arith.constant 0 : index
    %c0_0 = arith.constant 0 : index
    %0 = vector.load %arg6[%c0, %c0_0] : memref<1x32xf32, #tpu.memory_space<vmem>>, vector<1x32xf32>
    %c0_1 = arith.constant 0 : index
    %c0_2 = arith.constant 0 : index
    %1 = vector.load %arg7[%c0_1, %c0_2] : memref<1x32xf32, #tpu.memory_space<vmem>>, vector<1x32xf32>
    %c0_i32 = arith.constant 0 : i32
    %2 = arith.cmpi eq, %arg2, %c0_i32 : i32
    %3 = arith.extui %2 : i1 to i32
    %c0_i32_3 = arith.constant 0 : i32
    %4 = arith.cmpi ne, %3, %c0_i32_3 : i32
    scf.if %4 {
      %c0_24 = arith.constant 0 : index
      %c0_25 = arith.constant 0 : index
      %c0_26 = arith.constant 0 : index
      %51 = vector.load %arg4[%c0_24, %c0_25, %c0_26] : memref<1x128x32xf32, #tpu.memory_space<vmem>>, vector<1x128x32xf32>
      %52 = vector.shape_cast %51 : vector<1x128x32xf32> to vector<128x32xf32>
      %cst_27 = arith.constant dense<0.000000e+00> : vector<128xf32>
      %53 = vector.multi_reduction <add>, %52, %cst_27 [1] : vector<128x32xf32> to vector<128xf32>
      %54 = vector.shape_cast %53 : vector<128xf32> to vector<128x1xf32>
      %cst_28 = arith.constant 3.200000e+01 : f32
      %55 = vector.broadcast %cst_28 : f32 to vector<128x1xf32>
      %56 = arith.divf %54, %55 : vector<128x1xf32>
      %57 = vector.broadcast %56 : vector<128x1xf32> to vector<128x32xf32>
      %58 = arith.subf %52, %57 : vector<128x32xf32>
      %59 = arith.mulf %58, %58 : vector<128x32xf32>
      %cst_29 = arith.constant dense<0.000000e+00> : vector<128xf32>
      %60 = vector.multi_reduction <add>, %59, %cst_29 [1] : vector<128x32xf32> to vector<128xf32>
      %61 = vector.shape_cast %60 : vector<128xf32> to vector<128x1xf32>
      %cst_30 = arith.constant 3.200000e+01 : f32
      %62 = vector.broadcast %cst_30 : f32 to vector<128x1xf32>
      %63 = arith.divf %61, %62 : vector<128x1xf32>
      %cst_31 = arith.constant 9.99999974E-6 : f32
      %64 = vector.broadcast %cst_31 : f32 to vector<128x1xf32>
      %65 = arith.addf %63, %64 : vector<128x1xf32>
      %66 = math.rsqrt %65 : vector<128x1xf32>
      %67 = vector.broadcast %66 : vector<128x1xf32> to vector<128x32xf32>
      %68 = arith.mulf %58, %67 : vector<128x32xf32>
      %69 = vector.broadcast %0 : vector<1x32xf32> to vector<128x32xf32>
      %70 = arith.mulf %68, %69 : vector<128x32xf32>
      %71 = vector.broadcast %1 : vector<1x32xf32> to vector<128x32xf32>
      %72 = arith.addf %70, %71 : vector<128x32xf32>
      %73 = arith.truncf %72 : vector<128x32xf32> to vector<128x32xbf16>
      %c0_32 = arith.constant 0 : index
      %c0_33 = arith.constant 0 : index
      %74 = vector.load %arg9[%c0_32, %c0_33] : memref<128x32xbf16, #tpu.memory_space<vmem>>, vector<128x32xbf16>
      tpu.vector_store %arg9[%c0_32, %c0_33], %73 {strides = array<i32>} : memref<128x32xbf16, #tpu.memory_space<vmem>>, vector<128x32xbf16>,
    } else {
    }
    %c0_4 = arith.constant 0 : index
    %c0_5 = arith.constant 0 : index
    %c0_6 = arith.constant 0 : index
    %5 = vector.load %arg3[%c0_4, %c0_5, %c0_6] : memref<1x128x32xf32, #tpu.memory_space<vmem>>, vector<1x128x32xf32>
    %6 = vector.shape_cast %5 : vector<1x128x32xf32> to vector<128x32xf32>
    %cst = arith.constant dense<0.000000e+00> : vector<128xf32>
    %7 = vector.multi_reduction <add>, %6, %cst [1] : vector<128x32xf32> to vector<128xf32>
    %8 = vector.shape_cast %7 : vector<128xf32> to vector<128x1xf32>
    %cst_7 = arith.constant 3.200000e+01 : f32
    %9 = vector.broadcast %cst_7 : f32 to vector<128x1xf32>
    %10 = arith.divf %8, %9 : vector<128x1xf32>
    %11 = vector.broadcast %10 : vector<128x1xf32> to vector<128x32xf32>
    %12 = arith.subf %6, %11 : vector<128x32xf32>
    %13 = arith.mulf %12, %12 : vector<128x32xf32>
    %cst_8 = arith.constant dense<0.000000e+00> : vector<128xf32>
    %14 = vector.multi_reduction <add>, %13, %cst_8 [1] : vector<128x32xf32> to vector<128xf32>
    %15 = vector.shape_cast %14 : vector<128xf32> to vector<128x1xf32>
    %cst_9 = arith.constant 3.200000e+01 : f32
    %16 = vector.broadcast %cst_9 : f32 to vector<128x1xf32>
    %17 = arith.divf %15, %16 : vector<128x1xf32>
    %cst_10 = arith.constant 9.99999974E-6 : f32
    %18 = vector.broadcast %cst_10 : f32 to vector<128x1xf32>
    %19 = arith.addf %17, %18 : vector<128x1xf32>
    %20 = math.rsqrt %19 : vector<128x1xf32>
    %21 = vector.broadcast %20 : vector<128x1xf32> to vector<128x32xf32>
    %22 = arith.mulf %12, %21 : vector<128x32xf32>
    %23 = vector.broadcast %0 : vector<1x32xf32> to vector<128x32xf32>
    %24 = arith.mulf %22, %23 : vector<128x32xf32>
    %25 = vector.broadcast %1 : vector<1x32xf32> to vector<128x32xf32>
    %26 = arith.addf %24, %25 : vector<128x32xf32>
    %cst_11 = arith.constant 0.176776692 : f32
    %27 = vector.broadcast %cst_11 : f32 to vector<128x32xf32>
    %28 = arith.mulf %26, %27 : vector<128x32xf32>
    %29 = arith.truncf %28 : vector<128x32xf32> to vector<128x32xbf16>
    %c0_12 = arith.constant 0 : index
    %c0_13 = arith.constant 0 : index
    %30 = vector.load %arg9[%c0_12, %c0_13] : memref<128x32xbf16, #tpu.memory_space<vmem>>, vector<128x32xbf16>
    %cst_14 = arith.constant dense<0.000000e+00> : vector<128x128xf32>
    %31 = tpu.matmul %29, %30, %cst_14 {dimension_numbers = #tpu.dot_dimension_numbers<[1], [1], [0], [0], [0, 0, 1, 0], [], []>} : vector<128x32xbf16>, vector<128x32xbf16>, vector<128x128xf32> -> vector<128x128xf32>
    %cst_15 = arith.constant dense<0xFF800000> : vector<128xf32>
    %32 = vector.multi_reduction <maximumf>, %31, %cst_15 [1] : vector<128x128xf32> to vector<128xf32>
    %33 = vector.shape_cast %32 : vector<128xf32> to vector<128x1xf32>
    %34 = vector.broadcast %33 : vector<128x1xf32> to vector<128x128xf32>
    %35 = arith.subf %31, %34 : vector<128x128xf32>
    %36 = arith.truncf %35 : vector<128x128xf32> to vector<128x128xbf16>
    %37 = math.exp %36 : vector<128x128xbf16>
    %38 = arith.extf %37 : vector<128x128xbf16> to vector<128x128xf32>
    %cst_16 = arith.constant dense<0.000000e+00> : vector<128xf32>
    %39 = vector.multi_reduction <add>, %38, %cst_16 [1] : vector<128x128xf32> to vector<128xf32>
    %40 = vector.shape_cast %39 : vector<128xf32> to vector<128x1xf32>
    %c0_17 = arith.constant 0 : index
    %c0_18 = arith.constant 0 : index
    %c0_19 = arith.constant 0 : index
    %41 = vector.load %arg5[%c0_17, %c0_18, %c0_19] : memref<1x128x16xf32, #tpu.memory_space<vmem>>, vector<1x128x16xf32>
    %42 = vector.shape_cast %41 : vector<1x128x16xf32> to vector<128x16xf32>
    %43 = arith.truncf %42 : vector<128x16xf32> to vector<128x16xbf16>
    %cst_20 = arith.constant dense<0.000000e+00> : vector<128x16xf32>
    %44 = tpu.matmul %37, %43, %cst_20 {dimension_numbers = #tpu.dot_dimension_numbers<[1], [0], [0], [1], [0, 0, 1, 1], [], []>} : vector<128x128xbf16>, vector<128x16xbf16>, vector<128x16xf32> -> vector<128x16xf32>
    %45 = tpu.reciprocal %40 {approx = true} : vector<128x1xf32> -> vector<128x1xf32>
    %46 = vector.broadcast %45 : vector<128x1xf32> to vector<128x16xf32>
    %47 = arith.mulf %44, %46 : vector<128x16xf32>
    %c0_21 = arith.constant 0 : index
    %c0_22 = arith.constant 0 : index
    %c0_23 = arith.constant 0 : index
    %48 = vector.load %arg8[%c0_21, %c0_22, %c0_23] : memref<1x128x16xf32, #tpu.memory_space<vmem>>, vector<1x128x16xf32>
    %49 = vector.shape_cast %48 : vector<1x128x16xf32> to vector<128x16xf32>
    %50 = vector.shape_cast %47 : vector<128x16xf32> to vector<1x128x16xf32>
    tpu.vector_store %arg8[%c0_21, %c0_22, %c0_23], %50 {strides = array<i32>} : memref<1x128x16xf32, #tpu.memory_space<vmem>>, vector<1x128x16xf32>,
    return
  }
  func.func @transform_0(%arg0: i32, %arg1: i32, %arg2: i32) -> (i32, i32, i32) {
    %c1_i32 = arith.constant 1 : i32
    %0 = arith.muli %arg1, %c1_i32 : i32
    %1 = arith.addi %0, %arg2 : i32
    %c0_i32 = arith.constant 0 : i32
    %c0_i32_0 = arith.constant 0 : i32
    return %arg0, %1, %c0_i32 : i32, i32, i32
  }
  func.func @transform_1(%arg0: i32, %arg1: i32, %arg2: i32) -> (i32, i32, i32) {
    %c0_i32 = arith.constant 0 : i32
    %c0_i32_0 = arith.constant 0 : i32
    %c0_i32_1 = arith.constant 0 : i32
    return %arg0, %c0_i32, %c0_i32_0 : i32, i32, i32
  }
  func.func @transform_2(%arg0: i32, %arg1: i32, %arg2: i32) -> (i32, i32, i32) {
    %c0_i32 = arith.constant 0 : i32
    %c0_i32_0 = arith.constant 0 : i32
    %c0_i32_1 = arith.constant 0 : i32
    return %arg0, %c0_i32, %c0_i32_0 : i32, i32, i32
  }
  func.func @transform_3(%arg0: i32, %arg1: i32, %arg2: i32) -> (i32, i32) {
    %c0_i32 = arith.constant 0 : i32
    %c0_i32_0 = arith.constant 0 : i32
    %c0_i32_1 = arith.constant 0 : i32
    return %c0_i32, %c0_i32_0 : i32, i32
  }
  func.func @transform_4(%arg0: i32, %arg1: i32, %arg2: i32) -> (i32, i32) {
    %c0_i32 = arith.constant 0 : i32
    %c0_i32_0 = arith.constant 0 : i32
    %c0_i32_1 = arith.constant 0 : i32
    return %c0_i32, %c0_i32_0 : i32, i32
  }
  func.func @transform_5(%arg0: i32, %arg1: i32, %arg2: i32) -> (i32, i32, i32) {
    %c1_i32 = arith.constant 1 : i32
    %0 = arith.muli %arg1, %c1_i32 : i32
    %1 = arith.addi %0, %arg2 : i32
    %c0_i32 = arith.constant 0 : i32
    %c0_i32_0 = arith.constant 0 : i32
    return %arg0, %1, %c0_i32 : i32, i32, i32
  }
}

</mosaic_0001>

<bundles_post_ra>
// kernel: tpu_custom_call.1
= control target key start
LH: loop header
LB: loop body
LE: loop exit
PB: predicated region body
PF: predicated region fallthrough
CT: control target
= control target key end

     0   :  { %s2063_s18 = smov 0   ;;  %s2065_s19 = smov 0   ;;  %s3115_s0 = inlined_call_operand.vmem [shape: f32[2,128,32], index: 0, kind: input, shape index: {}]   ;;  %s3116_s1 = inlined_call_operand.vmem [shape: f32[2,128,32], index: 1, kind: input, shape index: {}]   ;;  %s3117_s2 = inlined_call_operand.vmem [shape: f32[2,128,16], index: 2, kind: input, shape index: {}]   ;;  %s3118_s3 = inlined_call_operand.vmem [shape: f32[1,32], index: 3, kind: input, shape index: {}]   ;;  %s3119_s4 = inlined_call_operand.vmem [shape: f32[1,32], index: 4, kind: input, shape index: {}]   ;;  %s3120_s5 = inlined_call_operand.vmem [shape: f32[2,128,16], index: 5, kind: output, shape index: {}]  }
   0x1   :  { %s2067_s20 = smov 0  }
   0x2 LB: > { %s34_s21 = sadd.s32 1, %s2026_s19  ;;  %p1770_p0 = scmp.ge.s32.totalorder %s2030_s20, 1  ;;  %s2030_s20 = sphi %s2067_s20, %s15_s20   ;;  %s2026_s19 = sphi %s2065_s19, %s3148_s19   ;;  %s2022_s18 = sphi %s2063_s18, %s3147_s18  }
   0x3   : > { %p36_p1 = scmp.ge.s32.totalorder %s34_s21, 2  ;;  %p241_p2 = scmp.lt.s32.totalorder %s2030_s20, 3 }
   0x5   : > { %s3150_s21 = smov (%p36_p1, %s34_s21), 0  ;;  %p242_p3 = pnand %p1770_p0, %p241_p2 }
   0x6   : > { %p291_p4 = scmp.lt.s32.totalorder (!%p242_p3), %s2022_s18, 1 }
   0x7   : > { %245 = sbr.rel (%p242_p3) target bundleno = 1020 (0x3fc), region = 40 }
   0xc   : > { %s3152_s18 = smov (!%p291_p4, %s2022_s18), 1  ;;  %vm345_vm0 = vcmask 261120   ;;  %v2032_v32 = vmov 32.0   ;;  %vm759_vm5 = vcmask 257024  }
   0xd   : > { %s2081_s22 = sshll.u32 %s3152_s18, 7  ;;  %1876 = vrcp.f32 %v2032_v32 }
   0xe   : > { %s2087_s25 = scalar_lea.vmem %s3116_s1, %s2081_s22  ;;  %s2178_s28 = scalar_lea.vmem %s3115_s0, %s2081_s22 }
   0xf   : > { %v343_v0 = vld [vmem:[%s2087_s25 + $0x70] sm:$0xff]  ;;  %v2091_v1 = vld [vmem:[%s2087_s25 + $0x60] sm:$0xff]  ;;  %v2102_v6 = vld [vmem:[%s2087_s25 + $0x78] sm:$0xff]  ;;  %s3004_s14 = scalar_lea.vmem %s3117_s2, %s2081_s22  ;;  %s3069_s17 = scalar_lea.vmem %s3120_s5, %s2081_s22 }
  0x10   : > { %v388_v2 = vsel %vm345_vm0, %v343_v0, 0.0  ;;  %v382_v3 = vsel %vm345_vm0, %v2091_v1, 0.0  ;;  %v2097_v4 = vld [vmem:[%s2087_s25 + $0x50] sm:$0xff]  ;;  %v2105_v7 = vld [vmem:[%s2087_s25 + $0x68] sm:$0xff]  ;;  %v2108_v8 = vld [vmem:[%s2087_s25 + $0x58] sm:$0xff]  ;;  %v391_v9 = vsel %vm345_vm0, %v2102_v6, 0.0 }
  0x11   : > { %389 = vadd.xlane.f32.xlu0 %v388_v2  ;;  %383 = vadd.xlane.f32.xlu1 %v382_v3  ;;  %v376_v5 = vsel %vm345_vm0, %v2097_v4, 0.0  ;;  %v385_v10 = vsel %vm345_vm0, %v2105_v7, 0.0  ;;  %v379_v11 = vsel %vm345_vm0, %v2108_v8, 0.0  ;;  %v2117_v12 = vld [vmem:[%s2087_s25 + $0x40] sm:$0xff]  ;;  %v2120_v13 = vld [vmem:[%s2087_s25 + $0x48] sm:$0xff]  ;;  %v2123_v14 = vld [vmem:[%s2087_s25 + $0x30] sm:$0xff] }
  0x12   : > { %377 = vadd.xlane.f32.xlu2 %v376_v5  ;;  %v370_v15 = vsel %vm345_vm0, %v2117_v12, 0.0  ;;  %v373_v16 = vsel %vm345_vm0, %v2120_v13, 0.0  ;;  %v364_v17 = vsel %vm345_vm0, %v2123_v14, 0.0  ;;  %v2132_v18 = vld [vmem:[%s2087_s25 + $0x38] sm:$0xff]  ;;  %v2135_v19 = vld [vmem:[%s2087_s25 + $0x20] sm:$0xff]  ;;  %v2138_v20 = vld [vmem:[%s2087_s25 + $0x28] sm:$0xff] }
  0x13   : > { %v367_v21 = vsel %vm345_vm0, %v2132_v18, 0.0  ;;  %v358_v22 = vsel %vm345_vm0, %v2135_v19, 0.0  ;;  %v361_v23 = vsel %vm345_vm0, %v2138_v20, 0.0  ;;  %v2147_v24 = vld [vmem:[%s2087_s25 + $0x18] sm:$0xff]  ;;  %v2150_v25 = vld [vmem:[%s2087_s25 + $0x8] sm:$0xff]  ;;  %v2153_v26 = vld [vmem:[%s2087_s25 + $0x10] sm:$0xff]  ;;  %v1877_v33 = vpop.eup %1876 }
  0x14   : > { %v355_v27 = vsel %vm345_vm0, %v2147_v24, 0.0  ;;  %v349_v28 = vsel %vm345_vm0, %v2150_v25, 0.0  ;;  %v352_v29 = vsel %vm345_vm0, %v2153_v26, 0.0  ;;  %v2162_v30 = vld [vmem:[%s2087_s25] sm:$0xff]  ;;  %v395_v34 = vmul.f32 32.0, %v1877_v33  ;;  %v2192_v56 = vld [vmem:[%s2178_s28 + $0x30] sm:$0xff] }
  0x15   : > { %v346_v31 = vsel %vm345_vm0, %v2162_v30, 0.0  ;;  %vm399_vm1 = vweird.f32 %v1877_v33  ;;  %v811_v61 = vsel %vm345_vm0, %v2192_v56, 0.0 }
  0x16   : > { %v396_v35 = vsub.f32 1.0, %v395_v34 }
  0x18   : > { %v397_v36 = vmul.f32 %v1877_v33, %v396_v35 }
  0x19   : > { %392 = vadd.xlane.f32.xlu0 %v391_v9  ;;  %386 = vadd.xlane.f32.xlu1 %v385_v10 }
  0x1a   : > { %380 = vadd.xlane.f32.xlu2 %v379_v11  ;;  %v398_v37 = vadd.f32 %v1877_v33, %v397_v36 }
  0x1c   : > { %v2166_v38 = vsel %vm399_vm1, %v1877_v33, %v398_v37 }
  0x21   : > { %371 = vadd.xlane.f32.xlu0 %v370_v15  ;;  %374 = vadd.xlane.f32.xlu1 %v373_v16  ;;  %v2224_v16 = vld [vmem:[%s2178_s28 + $0x38] sm:$0xff] }
  0x22   : > { %365 = vadd.xlane.f32.xlu2 %v364_v17  ;;  %v2227_v17 = vld [vmem:[%s2178_s28 + $0x8] sm:$0xff] }
  0x29   : > { %368 = vadd.xlane.f32.xlu0 %v367_v21  ;;  %359 = vadd.xlane.f32.xlu1 %v358_v22  ;;  %v2230_v22 = vld [vmem:[%s2178_s28 + $0x48] sm:$0xff] }
  0x2a   : > { %362 = vadd.xlane.f32.xlu2 %v361_v23  ;;  %v820_v32 = vsel %vm345_vm0, %v2230_v22, 0.0 }
  0x31   : > { %356 = vadd.xlane.f32.xlu0 %v355_v27  ;;  %350 = vadd.xlane.f32.xlu1 %v349_v28  ;;  %v814_v28 = vsel %vm345_vm0, %v2224_v16, 0.0 }
  0x32   : > { %353 = vadd.xlane.f32.xlu2 %v352_v29  ;;  %v796_v29 = vsel %vm345_vm0, %v2227_v17, 0.0 }
  0x39   : > { %347 = vadd.xlane.f32.xlu0 %v346_v31 }
  0x84   : > { %v390_v39 = vpop.xlane.xlu0 %389  ;;  %v384_v40 = vpop.xlane.xlu1 %383 }
  0x85   : > { %v415_v41 = vmul.f32 %v2166_v38, %v390_v39  ;;  %v378_v42 = vpop.xlane.xlu2 %377  ;;  %v413_v53 = vmul.f32 %v2166_v38, %v384_v40 }
  0x86   : > { %v411_v50 = vmul.f32 %v2166_v38, %v378_v42 }
  0x87   : > { %v2169_v43 = vsub.f32 %v343_v0, %v415_v41  ;;  %v2207_v62 = vsub.f32 %v2091_v1, %v413_v53 }
  0x88   : > { %v2195_v57 = vsub.f32 %v2097_v4, %v411_v50 }
  0x89   : > { %v447_v44 = vmul.f32 %v2169_v43, %v2169_v43  ;;  %v445_v1 = vmul.f32 %v2207_v62, %v2207_v62 }
  0x8a   : > { %v443_v3 = vmul.f32 %v2195_v57, %v2195_v57 }
  0x8b   : > { %v491_v45 = vsel %vm345_vm0, %v447_v44, 0.0 }
  0x8c   : > { %v393_v46 = vpop.xlane.xlu0 %392  ;;  %v387_v47 = vpop.xlane.xlu1 %386  ;;  %492 = vadd.xlane.f32.xlu0 %v491_v45  ;;  %v479_v5 = vsel %vm345_vm0, %v443_v3, 0.0 }
  0x8d   : > { %v416_v48 = vmul.f32 %v2166_v38, %v393_v46  ;;  %v414_v49 = vmul.f32 %v2166_v38, %v387_v47  ;;  %v381_v51 = vpop.xlane.xlu2 %380  ;;  %v2270_v46 = vld [vmem:[%s2178_s28] sm:$0xff] }
  0x8e   : > { %v412_v52 = vmul.f32 %v2166_v38, %v381_v51 }
  0x8f   : > { %v2186_v54 = vsub.f32 %v2102_v6, %v416_v48  ;;  %v2189_v55 = vsub.f32 %v2105_v7, %v414_v49  ;;  %v793_v49 = vsel %vm345_vm0, %v2270_v46, 0.0 }
  0x90   : > { %v2202_v60 = vsub.f32 %v2108_v8, %v412_v52  ;;  %v485_v8 = vsel %vm345_vm0, %v445_v1, 0.0 }
  0x91   : > { %v446_v58 = vmul.f32 %v2189_v55, %v2189_v55  ;;  %v448_v59 = vmul.f32 %v2186_v54, %v2186_v54 }
  0x92   : > { %v444_v4 = vmul.f32 %v2202_v60, %v2202_v60 }
  0x93   : > { %v488_v63 = vsel %vm345_vm0, %v446_v58, 0.0  ;;  %v494_v0 = vsel %vm345_vm0, %v448_v59, 0.0 }
  0x94   : > { %489 = vadd.xlane.f32.xlu2 %v488_v63  ;;  %495 = vadd.xlane.f32.xlu1 %v494_v0  ;;  %v372_v2 = vpop.xlane.xlu0 %371  ;;  %v375_v6 = vpop.xlane.xlu1 %374  ;;  %v482_v7 = vsel %vm345_vm0, %v444_v4, 0.0  ;;  %v2288_v63 = vld [vmem:[%s2178_s28 + $0x10] sm:$0xff] }
  0x95   : > { %812 = vadd.xlane.f32.xlu0 %v811_v61  ;;  %v409_v10 = vmul.f32 %v2166_v38, %v372_v2  ;;  %v410_v11 = vmul.f32 %v2166_v38, %v375_v6  ;;  %v366_v21 = vpop.xlane.xlu2 %365  ;;  %v2285_v61 = vld [vmem:[%s2178_s28 + $0x40] sm:$0xff] }
  0x96   : > { %v817_v3 = vsel %vm345_vm0, %v2285_v61, 0.0 }
  0x97   : > { %v2233_v23 = vsub.f32 %v2117_v12, %v409_v10  ;;  %v2236_v27 = vsub.f32 %v2120_v13, %v410_v11  ;;  %v407_v12 = vmul.f32 %v2166_v38, %v366_v21  ;;  %v2320_v21 = vld [vmem:[%s2178_s28 + $0x18] sm:$0xff] }
  0x99   : > { %v441_v13 = vmul.f32 %v2233_v23, %v2233_v23  ;;  %v442_v34 = vmul.f32 %v2236_v27, %v2236_v27  ;;  %v2256_v37 = vsub.f32 %v2123_v14, %v407_v12  ;;  %v2334_v12 = vld [vmem:[%s2178_s28 + $0x50] sm:$0xff] }
  0x9b   : > { %v473_v39 = vsel %vm345_vm0, %v441_v13, 0.0  ;;  %v476_v40 = vsel %vm345_vm0, %v442_v34, 0.0  ;;  %v439_v45 = vmul.f32 %v2256_v37, %v2256_v37  ;;  %v823_v34 = vsel %vm345_vm0, %v2334_v12, 0.0 }
  0x9c   : > { %480 = vadd.xlane.f32.xlu2 %v479_v5  ;;  %486 = vadd.xlane.f32.xlu1 %v485_v8  ;;  %v369_v9 = vpop.xlane.xlu0 %368  ;;  %v360_v33 = vpop.xlane.xlu1 %359  ;;  %v799_v5 = vsel %vm345_vm0, %v2288_v63, 0.0 }
  0x9d   : > { %483 = vadd.xlane.f32.xlu0 %v482_v7  ;;  %v408_v15 = vmul.f32 %v2166_v38, %v369_v9  ;;  %v405_v35 = vmul.f32 %v2166_v38, %v360_v33  ;;  %v363_v36 = vpop.xlane.xlu2 %362  ;;  %v467_v48 = vsel %vm345_vm0, %v439_v45, 0.0  ;;  %v2331_v33 = vld [vmem:[%s2178_s28 + $0x58] sm:$0xff] }
  0x9e   : > { %v406_v44 = vmul.f32 %v2166_v38, %v363_v36  ;;  %v826_v13 = vsel %vm345_vm0, %v2331_v33, 0.0  ;;  %v2346_v36 = vld [vmem:[%s2178_s28 + $0x60] sm:$0xff] }
  0x9f   : > { %v2243_v31 = vsub.f32 %v2132_v18, %v408_v15  ;;  %v2261_v41 = vsub.f32 %v2135_v19, %v405_v35  ;;  %v2341_v35 = vld [vmem:[%s2178_s28 + $0x28] sm:$0xff] }
  0xa0   : > { %v2273_v19 = vsub.f32 %v2138_v20, %v406_v44 }
  0xa1   : > { %v440_v18 = vmul.f32 %v2243_v31, %v2243_v31  ;;  %v437_v14 = vmul.f32 %v2261_v41, %v2261_v41 }
  0xa2   : > { %v438_v20 = vmul.f32 %v2273_v19, %v2273_v19 }
  0xa3   : > { %v470_v42 = vsel %vm345_vm0, %v440_v18, 0.0  ;;  %v461_v50 = vsel %vm345_vm0, %v437_v14, 0.0  ;;  %v808_v18 = vsel %vm345_vm0, %v2341_v35, 0.0 }
  0xa4   : > { %815 = vadd.xlane.f32.xlu1 %v814_v28  ;;  %797 = vadd.xlane.f32.xlu2 %v796_v29  ;;  %v357_v47 = vpop.xlane.xlu0 %356  ;;  %v351_v52 = vpop.xlane.xlu1 %350  ;;  %v464_v4 = vsel %vm345_vm0, %v438_v20, 0.0  ;;  %v2323_v28 = vld [vmem:[%s2178_s28 + $0x20] sm:$0xff]  ;;  %v802_v29 = vsel %vm345_vm0, %v2320_v21, 0.0 }
  0xa5   : > { %821 = vadd.xlane.f32.xlu0 %v820_v32  ;;  %v354_v51 = vpop.xlane.xlu2 %353  ;;  %v404_v53 = vmul.f32 %v2166_v38, %v357_v47  ;;  %v402_v59 = vmul.f32 %v2166_v38, %v351_v52  ;;  %v805_v32 = vsel %vm345_vm0, %v2323_v28, 0.0 }
  0xa6   : > { %v403_v58 = vmul.f32 %v2166_v38, %v354_v51 }
  0xa7   : > { %v2291_v0 = vsub.f32 %v2147_v24, %v404_v53  ;;  %v2300_v1 = vsub.f32 %v2150_v25, %v402_v59 }
  0xa8   : > { %v2294_v2 = vsub.f32 %v2153_v26, %v403_v58 }
  0xa9   : > { %v436_v26 = vmul.f32 %v2291_v0, %v2291_v0  ;;  %v434_v25 = vmul.f32 %v2300_v1, %v2300_v1 }
  0xaa   : > { %v435_v7 = vmul.f32 %v2294_v2, %v2294_v2 }
  0xab   : > { %v458_v9 = vsel %vm345_vm0, %v436_v26, 0.0  ;;  %v452_v11 = vsel %vm345_vm0, %v434_v25, 0.0 }
  0xac   : > { %474 = vadd.xlane.f32.xlu1 %v473_v39  ;;  %477 = vadd.xlane.f32.xlu2 %v476_v40  ;;  %v348_v6 = vpop.xlane.xlu0 %347  ;;  %v455_v10 = vsel %vm345_vm0, %v435_v7, 0.0  ;;  %v829_v39 = vsel %vm345_vm0, %v2346_v36, 0.0 }
  0xad   : > { %471 = vadd.xlane.f32.xlu0 %v470_v42  ;;  %v401_v24 = vmul.f32 %v2166_v38, %v348_v6 }
  0xaf   : > { %v2312_v8 = vsub.f32 %v2162_v30, %v401_v24 }
  0xb1   : > { %v433_v15 = vmul.f32 %v2312_v8, %v2312_v8 }
  0xb3   : > { %v449_v30 = vsel %vm345_vm0, %v433_v15, 0.0 }
  0xb4   : > { %468 = vadd.xlane.f32.xlu2 %v467_v48  ;;  %794 = vadd.xlane.f32.xlu1 %v793_v49 }
  0xb5   : > { %462 = vadd.xlane.f32.xlu0 %v461_v50 }
  0xbc   : > { %818 = vadd.xlane.f32.xlu2 %v817_v3  ;;  %465 = vadd.xlane.f32.xlu1 %v464_v4 }
  0xbd   : > { %800 = vadd.xlane.f32.xlu0 %v799_v5 }
  0xc4   : > { %459 = vadd.xlane.f32.xlu2 %v458_v9  ;;  %456 = vadd.xlane.f32.xlu1 %v455_v10 }
  0xc5   : > { %453 = vadd.xlane.f32.xlu0 %v452_v11 }
  0xcc   : > { %450 = vadd.xlane.f32.xlu2 %v449_v30  ;;  %803 = vadd.xlane.f32.xlu1 %v802_v29  ;;  %v2378_v29 = vld [vmem:[%s2178_s28 + $0x68] sm:$0xff] }
  0xcd   : > { %806 = vadd.xlane.f32.xlu0 %v805_v32 }
  0xd4   : > { %827 = vadd.xlane.f32.xlu2 %v826_v13  ;;  %824 = vadd.xlane.f32.xlu1 %v823_v34 }
  0xdc   : > { %809 = vadd.xlane.f32.xlu1 %v808_v18 }
  0xe4   : > { %830 = vadd.xlane.f32.xlu1 %v829_v39  ;;  %v2386_v39 = vld [vmem:[%s3118_s3] ss:$0 sm:$0xff] }
  0xff   : > { %v493_v40 = vpop.xlane.xlu0 %492 }
 0x100   : > { %v511_v42 = vmul.f32 %v493_v40, %v2166_v38 }
 0x102   : > { %v527_v44 = vadd.f32 1e-05, %v511_v42 }
 0x104   : > { %1878 = vrsqrt.f32 %v527_v44  ;;  %vm675_vm2 = vweird.f32 %v527_v44 }
 0x107   : > { %v490_v45 = vpop.xlane.xlu2 %489  ;;  %v496_v14 = vpop.xlane.xlu1 %495 }
 0x108   : > { %v510_v47 = vmul.f32 %v490_v45, %v2166_v38  ;;  %v512_v48 = vmul.f32 %v496_v14, %v2166_v38  ;;  %v813_v49 = vpop.xlane.xlu0 %812  ;;  %v832_v45 = vsel %vm345_vm0, %v2378_v29, 0.0  ;;  %v2398_v14 = vld [vmem:[%s3119_s4] ss:$0 sm:$0xff] }
 0x109   : > { %v854_v50 = vmul.f32 %v813_v49, %v2166_v38 }
 0x10a   : > { %v1879_v51 = vpop.eup %1878  ;;  %v2354_v52 = vadd.f32 1e-05, %v510_v47  ;;  %v2356_v53 = vadd.f32 1e-05, %v512_v48 }
 0x10b   : > { %v670_v58 = vmul.f32 %v1879_v51, %v527_v44  ;;  %v2359_v20 = vsub.f32 %v2192_v56, %v854_v50  ;;  %vm676_vm3 = vweird.f32 %v1879_v51 }
 0x10c   : > { %1880 = vrsqrt.f32 %v2354_v52  ;;  %vm2369_vm4 = vmor %vm675_vm2, %vm676_vm3  ;;  %vm685_vm6 = vweird.f32 %v2356_v53  ;;  %vm665_vm8 = vweird.f32 %v2354_v52 }
 0x10d   : > { %v671_v59 = vmul.f32 %v1879_v51, %v670_v58  ;;  %1882 = vrsqrt.f32 %v2356_v53  ;;  %v886_v3 = vmul.f32 %v2359_v20, %v2359_v20 }
 0x10f   : > { %v672_v4 = vmul.f32 0.5, %v671_v59  ;;  %v481_v5 = vpop.xlane.xlu2 %480  ;;  %v487_v6 = vpop.xlane.xlu1 %486  ;;  %v914_v24 = vsel %vm345_vm0, %v886_v3, 0.0 }
 0x110   : > { %v507_v26 = vmul.f32 %v481_v5, %v2166_v38  ;;  %v509_v56 = vmul.f32 %v487_v6, %v2166_v38  ;;  %v484_v7 = vpop.xlane.xlu0 %483  ;;  %915 = vadd.xlane.f32.xlu2 %v914_v24 }
 0x111   : > { %v673_v25 = vsub.f32 1.5, %v672_v4  ;;  %v508_v9 = vmul.f32 %v484_v7, %v2166_v38 }
 0x112   : > { %v1881_v10 = vpop.eup %1880  ;;  %v2373_v15 = vadd.f32 1e-05, %v507_v26  ;;  %v2375_v30 = vadd.f32 1e-05, %v509_v56 }
 0x113   : > { %v1883_v32 = vpop.eup %1882  ;;  %v674_v13 = vmul.f32 %v1879_v51, %v673_v25  ;;  %v660_v34 = vmul.f32 %v1881_v10, %v2354_v52  ;;  %v2381_v18 = vadd.f32 1e-05, %v508_v9  ;;  %vm666_vm9 = vweird.f32 %v1881_v10 }
 0x114   : > { %v680_v40 = vmul.f32 %v1883_v32, %v2356_v53  ;;  %1884 = vrsqrt.f32 %v2373_v15  ;;  %vm686_vm7 = vweird.f32 %v1883_v32  ;;  %vm635_vm11 = vweird.f32 %v2373_v15  ;;  %vm667_vm14 = vmor %vm665_vm8, %vm666_vm9 }
 0x115   : > { %v678_v42 = vsel %vm2369_vm4, %v1879_v51, %v674_v13  ;;  %v661_v44 = vmul.f32 %v1881_v10, %v660_v34  ;;  %1886 = vrsqrt.f32 %v2375_v30  ;;  %vm645_vm10 = vweird.f32 %v2381_v18  ;;  %vm2421_vm12 = vmor %vm685_vm6, %vm686_vm7 }
 0x116   : > { %v703_v47 = vmul.f32 %v678_v42, %v2169_v43  ;;  %v681_v48 = vmul.f32 %v1883_v32, %v680_v40  ;;  %1888 = vrsqrt.f32 %v2381_v18  ;;  %vm655_vm15 = vweird.f32 %v2375_v30 }
 0x117   : > { %v662_v49 = vmul.f32 0.5, %v661_v44  ;;  %v816_v50 = vpop.xlane.xlu1 %815  ;;  %v798_v51 = vpop.xlane.xlu2 %797 }
 0x118   : > { %v722_v58 = vmul.f32 %v2386_v39, %v703_v47  ;;  %v682_v59 = vmul.f32 0.5, %v681_v48  ;;  %v855_v3 = vmul.f32 %v816_v50, %v2166_v38  ;;  %v822_v4 = vpop.xlane.xlu0 %821  ;;  %833 = vadd.xlane.f32.xlu2 %v832_v45  ;;  %v849_v5 = vmul.f32 %v798_v51, %v2166_v38 }
 0x119   : > { %v663_v43 = vsub.f32 1.5, %v662_v49  ;;  %v857_v7 = vmul.f32 %v822_v4, %v2166_v38 }
 0x11a   : > { %v2408_v6 = vpop.eup %1884  ;;  %v741_v24 = vadd.f32 %v2398_v14, %v722_v58  ;;  %v683_v26 = vsub.f32 1.5, %v682_v59  ;;  %v2413_v56 = vsub.f32 %v2224_v16, %v855_v3  ;;  %v2429_v16 = vsub.f32 %v2227_v17, %v849_v5 }
 0x11b   : > { %v2416_v25 = vpop.eup %1886  ;;  %v664_v9 = vmul.f32 %v1881_v10, %v663_v43  ;;  %v630_v13 = vmul.f32 %v2408_v6, %v2373_v15  ;;  %vm636_vm13 = vweird.f32 %v2408_v6 }
 0x11c   : > { %v2431_v34 = vpop.eup %1888  ;;  %v757_v40 = vpack.c.bf16 %v741_v24, %v741_v24  ;;  %v684_v53 = vmul.f32 %v1883_v32, %v683_v26  ;;  %v650_v42 = vmul.f32 %v2416_v25, %v2375_v30  ;;  %vm656_vm1 = vweird.f32 %v2416_v25  ;;  %vm637_vm3 = vmor %vm635_vm11, %vm636_vm13 }
 0x11d   : > { %v668_v44 = vsel %vm667_vm14, %v1881_v10, %v664_v9  ;;  %v631_v45 = vmul.f32 %v2408_v6, %v630_v13  ;;  %v640_v17 = vmul.f32 %v2431_v34, %v2381_v18  ;;  %vm646_vm2 = vweird.f32 %v2431_v34  ;;  %vm657_vm6 = vmor %vm655_vm15, %vm656_vm1 }
 0x11e   : > { %774 = vst.msk [vmem:[#allocation2 + $0x38] sm:$0xf] %vm759_vm5, %v757_v40  ;;  %v702_v52 = vmul.f32 %v668_v44, %v2189_v55  ;;  %v688_v47 = vsel %vm2421_vm12, %v1883_v32, %v684_v53  ;;  %v651_v48 = vmul.f32 %v2416_v25, %v650_v42  ;;  %v887_v49 = vmul.f32 %v2413_v56, %v2413_v56  ;;  %vm2477_vm4 = vmor %vm645_vm10, %vm646_vm2 }
 0x11f   : > { %v704_v10 = vmul.f32 %v688_v47, %v2186_v54  ;;  %v632_v50 = vmul.f32 0.5, %v631_v45  ;;  %v641_v51 = vmul.f32 %v2431_v34, %v640_v17  ;;  %v475_v58 = vpop.xlane.xlu1 %474  ;;  %v478_v59 = vpop.xlane.xlu2 %477  ;;  %v881_v3 = vmul.f32 %v2429_v16, %v2429_v16 }
 0x120   : > { %v721_v55 = vmul.f32 %v2386_v39, %v702_v52  ;;  %v652_v4 = vmul.f32 0.5, %v651_v48  ;;  %v505_v32 = vmul.f32 %v475_v58, %v2166_v38  ;;  %v472_v5 = vpop.xlane.xlu0 %471  ;;  %v917_v43 = vsel %vm345_vm0, %v887_v49, 0.0 }
 0x121   : > { %v723_v24 = vmul.f32 %v2386_v39, %v704_v10  ;;  %v633_v26 = vsub.f32 1.5, %v632_v50  ;;  %v642_v54 = vmul.f32 0.5, %v641_v51  ;;  %v504_v9 = vmul.f32 %v472_v5, %v2166_v38  ;;  %918 = vadd.xlane.f32.xlu0 %v917_v43  ;;  %v2498_v51 = vld [vmem:[%s2178_s28 + $0x70] sm:$0xff] }
 0x122   : > { %v740_v11 = vadd.f32 %v2398_v14, %v721_v55  ;;  %v653_v13 = vsub.f32 1.5, %v652_v4  ;;  %v2461_v40 = vadd.f32 1e-05, %v505_v32  ;;  %v506_v53 = vmul.f32 %v478_v59, %v2166_v38 }
 0x123   : > { %v742_v42 = vadd.f32 %v2398_v14, %v723_v24  ;;  %v634_v44 = vmul.f32 %v2408_v6, %v633_v26  ;;  %v643_v45 = vsub.f32 1.5, %v642_v54  ;;  %v2470_v17 = vadd.f32 1e-05, %v504_v9 }
 0x124   : > { %v756_v52 = vpack.c.bf16 %v740_v11, %v740_v11  ;;  %v654_v47 = vmul.f32 %v2416_v25, %v653_v13  ;;  %v2482_v49 = vsub.f32 %v2230_v22, %v857_v7  ;;  %1890 = vrsqrt.f32 %v2461_v40 }
 0x125   : > { %v758_v15 = vpack.c.bf16 %v742_v42, %v742_v42  ;;  %v638_v10 = vsel %vm637_vm3, %v2408_v6, %v634_v44  ;;  %v644_v50 = vmul.f32 %v2431_v34, %v643_v45  ;;  %1892 = vrsqrt.f32 %v2470_v17  ;;  %v2534_v45 = vld [vmem:[%s2178_s28 + $0x78] sm:$0xff] }
 0x126   : > { %773 = vst.msk [vmem:[#allocation2 + $0x34] sm:$0xf] %vm759_vm5, %v756_v52  ;;  %v699_v18 = vmul.f32 %v638_v10, %v2195_v57  ;;  %v658_v22 = vsel %vm657_vm6, %v2416_v25, %v654_v47  ;;  %v2495_v7 = vadd.f32 1e-05, %v506_v53  ;;  %v899_v58 = vsel %vm345_vm0, %v881_v3, 0.0 }
 0x127   : > { %775 = vst.msk [vmem:[#allocation2 + $0x3c] sm:$0xf] %vm759_vm5, %v758_v15  ;;  %v701_v6 = vmul.f32 %v658_v22, %v2207_v62  ;;  %v648_v30 = vsel %vm2477_vm4, %v2431_v34, %v644_v50  ;;  %v469_v59 = vpop.xlane.xlu2 %468  ;;  %v795_v55 = vpop.xlane.xlu1 %794  ;;  %900 = vadd.xlane.f32.xlu1 %v899_v58  ;;  %v835_v5 = vsel %vm345_vm0, %v2498_v51, 0.0  ;;  %v889_v34 = vmul.f32 %v2482_v49, %v2482_v49 }
 0x128   : > { %v718_v57 = vmul.f32 %v2386_v39, %v699_v18  ;;  %v700_v25 = vmul.f32 %v648_v30, %v2202_v60  ;;  %1894 = vrsqrt.f32 %v2495_v7  ;;  %v463_v4 = vpop.xlane.xlu0 %462  ;;  %v503_v24 = vmul.f32 %v469_v59, %v2166_v38 }
 0x129   : > { %v720_v32 = vmul.f32 %v2386_v39, %v701_v6  ;;  %v501_v62 = vmul.f32 %v463_v4, %v2166_v38  ;;  %v848_v26 = vmul.f32 %v795_v55, %v2166_v38  ;;  %vm615_vm7 = vweird.f32 %v2461_v40 }
 0x12a   : > { %v2515_v3 = vpop.eup %1890  ;;  %v737_v43 = vadd.f32 %v2398_v14, %v718_v57  ;;  %v719_v60 = vmul.f32 %v2386_v39, %v700_v25  ;;  %vm605_vm8 = vweird.f32 %v2470_v17  ;;  %v2539_v48 = vsel %vm345_vm0, %v889_v34, 0.0 }
 0x12b   : > { %v2521_v54 = vpop.eup %1892  ;;  %v739_v9 = vadd.f32 %v2398_v14, %v720_v32  ;;  %v610_v11 = vmul.f32 %v2515_v3, %v2461_v40  ;;  %v2527_v13 = vadd.f32 1e-05, %v501_v62  ;;  %v2545_v18 = vadd.f32 1e-05, %v503_v24 }
 0x12c   : > { %v753_v53 = vpack.c.bf16 %v737_v43, %v737_v43  ;;  %v738_v42 = vadd.f32 %v2398_v14, %v719_v60  ;;  %v600_v44 = vmul.f32 %v2521_v54, %v2470_v17  ;;  %v2548_v22 = vsub.f32 %v2270_v46, %v848_v26 }
 0x12d   : > { %v755_v52 = vpack.c.bf16 %v739_v9, %v739_v9  ;;  %v611_v47 = vmul.f32 %v2515_v3, %v610_v11  ;;  %1896 = vrsqrt.f32 %v2527_v13  ;;  %vm616_vm9 = vweird.f32 %v2515_v3 }
 0x12e   : > { %v2541_v15 = vpop.eup %1894  ;;  %770 = vst.msk [vmem:[#allocation2 + $0x28] sm:$0xf] %vm759_vm5, %v753_v53  ;;  %v754_v10 = vpack.c.bf16 %v738_v42, %v738_v42  ;;  %v601_v50 = vmul.f32 %v2521_v54, %v600_v44  ;;  %v1832_v6 = vld [vmem:[#allocation2 + $0x38] sm:$0xff]  ;;  %vm625_vm10 = vweird.f32 %v2495_v7  ;;  %v2557_v57 = vsel %vm345_vm0, %v2534_v45, 0.0  ;;  %vm2571_vm12 = vmor %vm615_vm7, %vm616_vm9 }
 0x12f   : > { %772 = vst.msk [vmem:[#allocation2 + $0x30] sm:$0xf] %vm759_vm5, %v755_v52  ;;  %v612_v30 = vmul.f32 0.5, %v611_v47  ;;  %v620_v58 = vmul.f32 %v2541_v15, %v2495_v7  ;;  %v819_v59 = vpop.xlane.xlu2 %818  ;;  %v466_v55 = vpop.xlane.xlu1 %465  ;;  %vm606_vm11 = vweird.f32 %v2521_v54  ;;  %1898 = vrsqrt.f32 %v2545_v18  ;;  %836 = vadd.xlane.f32.xlu1 %v835_v5 }
 0x130   : > { %771 = vst.msk [vmem:[#allocation2 + $0x2c] sm:$0xf] %vm759_vm5, %v754_v10  ;;  %v602_v46 = vmul.f32 0.5, %v601_v50  ;;  %v801_v25 = vpop.xlane.xlu0 %800  ;;  %v856_v4 = vmul.f32 %v819_v59, %v2166_v38  ;;  %v880_v43 = vmul.f32 %v2548_v22, %v2548_v22  ;;  %v502_v26 = vmul.f32 %v466_v55, %v2166_v38  ;;  %vm2587_vm13 = vmor %vm605_vm8, %vm606_vm11 }
 0x131   : > { %v613_v32 = vsub.f32 1.5, %v612_v30  ;;  %v621_v62 = vmul.f32 %v2541_v15, %v620_v58  ;;  %v850_v34 = vmul.f32 %v801_v25, %v2166_v38  ;;  %v1316_v9 = vsel %vm345_vm0, %v1832_v6, 0 }
 0x132   : > { %v603_v5 = vsub.f32 1.5, %v602_v46  ;;  %v2576_v24 = vsub.f32 %v2285_v61, %v856_v4  ;;  %vm575_vm14 = vweird.f32 %v2527_v13  ;;  %v896_v61 = vsel %vm345_vm0, %v880_v43, 0.0  ;;  %1318 = vmatpush.bf16.xpose.msra.mxu0 %v1316_v9  ;;  %1833 = vmatpush.bf16.xpose.msra.mxu2 %v1316_v9 }
 0x133   : > { %v2580_v11 = vpop.eup %1896  ;;  %v614_v53 = vmul.f32 %v2515_v3, %v613_v32  ;;  %v622_v42 = vmul.f32 0.5, %v621_v62  ;;  %v2597_v47 = vsub.f32 %v2288_v63, %v850_v34  ;;  %897 = vadd.xlane.f32.xlu0 %v896_v61  ;;  %v2599_v17 = vadd.f32 1e-05, %v502_v26 }
 0x134   : > { %v604_v44 = vmul.f32 %v2521_v54, %v603_v5  ;;  %v570_v52 = vmul.f32 %v2580_v11, %v2527_v13  ;;  %vm626_vm15 = vweird.f32 %v2541_v15  ;;  %v888_v6 = vmul.f32 %v2576_v24, %v2576_v24 }
 0x135   : > { %v618_v10 = vsel %vm2571_vm12, %v2515_v3, %v614_v53  ;;  %v623_v50 = vsub.f32 1.5, %v622_v42  ;;  %v2607_v30 = vpop.eup %1898  ;;  %1900 = vrsqrt.f32 %v2599_v17  ;;  %vm576_vm1 = vweird.f32 %v2580_v11  ;;  %vm627_vm3 = vmor %vm625_vm10, %vm626_vm15 }
 0x136   : > { %v697_v58 = vmul.f32 %v618_v10, %v2233_v23  ;;  %v608_v63 = vsel %vm2587_vm13, %v2521_v54, %v604_v44  ;;  %v571_v59 = vmul.f32 %v2580_v11, %v570_v52  ;;  %v590_v46 = vmul.f32 %v2607_v30, %v2545_v18  ;;  %vm2641_vm4 = vmor %vm575_vm14, %vm576_vm1  ;;  %v1831_v13 = vld [vmem:[#allocation2 + $0x30] sm:$0xff] }
 0x137   : > { %v696_v3 = vmul.f32 %v608_v63, %v2243_v31  ;;  %v624_v55 = vmul.f32 %v2541_v15, %v623_v50  ;;  %vm595_vm2 = vweird.f32 %v2545_v18  ;;  %v460_v23 = vpop.xlane.xlu2 %459  ;;  %v457_v25 = vpop.xlane.xlu1 %456  ;;  %v920_v32 = vsel %vm345_vm0, %v888_v6, 0.0 }
 0x138   : > { %v716_v4 = vmul.f32 %v2386_v39, %v697_v58  ;;  %v572_v54 = vmul.f32 0.5, %v571_v59  ;;  %v454_v31 = vpop.xlane.xlu0 %453  ;;  %v882_v62 = vmul.f32 %v2597_v47, %v2597_v47  ;;  %v591_v60 = vmul.f32 %v2607_v30, %v590_v46  ;;  %921 = vadd.xlane.f32.xlu2 %v920_v32 }
 0x139   : > { %v715_v34 = vmul.f32 %v2386_v39, %v696_v3  ;;  %v628_v43 = vsel %vm627_vm3, %v2541_v15, %v624_v55  ;;  %v498_v5 = vmul.f32 %v454_v31, %v2166_v38  ;;  %v500_v53 = vmul.f32 %v460_v23, %v2166_v38 }
 0x13a   : > { %v735_v26 = vadd.f32 %v2398_v14, %v716_v4  ;;  %v698_v7 = vmul.f32 %v628_v43, %v2236_v27  ;;  %v573_v9 = vsub.f32 1.5, %v572_v54  ;;  %v592_v42 = vmul.f32 0.5, %v591_v60 }
 0x13b   : > { %v734_v40 = vadd.f32 %v2398_v14, %v715_v34  ;;  %v2645_v61 = vadd.f32 1e-05, %v498_v5  ;;  %v499_v44 = vmul.f32 %v457_v25, %v2166_v38  ;;  %v2648_v52 = vpop.eup %1900  ;;  %v2652_v6 = vadd.f32 1e-05, %v500_v53  ;;  %924 = vadd.xlane.f32.xlu0 %v2539_v48  ;;  %v1830_v5 = vld [vmem:[#allocation2 + $0x28] sm:$0xff] }
 0x13c   : > { %v751_v27 = vpack.c.bf16 %v735_v26, %v735_v26  ;;  %v717_v10 = vmul.f32 %v2386_v39, %v698_v7  ;;  %v574_v50 = vmul.f32 %v2580_v11, %v573_v9  ;;  %v593_v63 = vsub.f32 1.5, %v592_v42 }
 0x13d   : > { %v750_v58 = vpack.c.bf16 %v734_v40, %v734_v40  ;;  %vm596_vm6 = vweird.f32 %v2607_v30  ;;  %v580_v59 = vmul.f32 %v2648_v52, %v2599_v17  ;;  %vm585_vm7 = vweird.f32 %v2599_v17 }
 0x13e   : > { %768 = vst.msk [vmem:[#allocation2 + $0x20] sm:$0xf] %vm759_vm5, %v751_v27  ;;  %v736_v3 = vadd.f32 %v2398_v14, %v717_v10  ;;  %v578_v55 = vsel %vm2641_vm4, %v2580_v11, %v574_v50  ;;  %1902 = vrsqrt.f32 %v2645_v61  ;;  %v594_v46 = vmul.f32 %v2607_v30, %v593_v63  ;;  %vm597_vm8 = vmor %vm595_vm2, %vm596_vm6 }
 0x13f   : > { %767 = vst.msk [vmem:[#allocation2 + $0x1c] sm:$0xf] %vm759_vm5, %v750_v58  ;;  %v693_v48 = vmul.f32 %v578_v55, %v2261_v41  ;;  %v581_v23 = vmul.f32 %v2648_v52, %v580_v59  ;;  %1904 = vrsqrt.f32 %v2652_v6  ;;  %v451_v25 = vpop.xlane.xlu2 %450  ;;  %v804_v4 = vpop.xlane.xlu1 %803  ;;  %vm586_vm9 = vweird.f32 %v2648_v52 }
 0x140   : > { %v752_v54 = vpack.c.bf16 %v736_v3, %v736_v3  ;;  %v2675_v11 = vadd.f32 1e-05, %v499_v44  ;;  %v1313_v41 = vsel %vm345_vm0, %v1831_v13, 0  ;;  %v598_v32 = vsel %vm597_vm8, %v2607_v30, %v594_v46  ;;  %839 = vadd.xlane.f32.xlu2 %v2557_v57  ;;  %v807_v26 = vpop.xlane.xlu0 %806  ;;  %vm2697_vm10 = vmor %vm585_vm7, %vm586_vm9 }
 0x141   : > { %v712_v31 = vmul.f32 %v2386_v39, %v693_v48  ;;  %v582_v34 = vmul.f32 0.5, %v581_v23  ;;  %1319 = vmatpush.bf16.xpose.msra.mxu0 %v1313_v41  ;;  %1834 = vmatpush.bf16.xpose.msra.mxu2 %v1313_v41  ;;  %v497_v43 = vmul.f32 %v451_v25, %v2166_v38  ;;  %v695_v18 = vmul.f32 %v598_v32, %v2256_v37 }
 0x142   : > { %769 = vst.msk [vmem:[#allocation2 + $0x24] sm:$0xf] %vm759_vm5, %v752_v54  ;;  %1906 = vrsqrt.f32 %v2675_v11  ;;  %v902_v60 = vsel %vm345_vm0, %v882_v62, 0.0  ;;  %v851_v53 = vmul.f32 %v804_v4, %v2166_v38  ;;  %vm545_vm11 = vweird.f32 %v2645_v61 }
 0x143   : > { %v731_v7 = vadd.f32 %v2398_v14, %v712_v31  ;;  %v583_v30 = vsub.f32 1.5, %v582_v34  ;;  %v2687_v9 = vadd.f32 1e-05, %v497_v43  ;;  %v714_v15 = vmul.f32 %v2386_v39, %v695_v18  ;;  %903 = vadd.xlane.f32.xlu0 %v902_v60 }
 0x144   : > { %v2690_v40 = vpop.eup %1902  ;;  %vm565_vm12 = vweird.f32 %v2652_v6  ;;  %vm555_vm13 = vweird.f32 %v2675_v11  ;;  %v852_v17 = vmul.f32 %v807_v26, %v2166_v38  ;;  %v1310_v50 = vsel %vm345_vm0, %v1830_v5, 0 }
 0x145   : > { %v2703_v57 = vpop.eup %1904  ;;  %v747_v62 = vpack.c.bf16 %v731_v7, %v731_v7  ;;  %v584_v42 = vmul.f32 %v2648_v52, %v583_v30  ;;  %v540_v44 = vmul.f32 %v2690_v40, %v2645_v61  ;;  %v733_v27 = vadd.f32 %v2398_v14, %v714_v15 }
 0x146   : > { %v560_v10 = vmul.f32 %v2703_v57, %v2652_v6  ;;  %1908 = vrsqrt.f32 %v2687_v9  ;;  %vm546_vm14 = vweird.f32 %v2690_v40  ;;  %v2722_v63 = vsub.f32 %v2320_v21, %v851_v53 }
 0x147   : > { %764 = vst.msk [vmem:[#allocation2 + $0x10] sm:$0xf] %vm759_vm5, %v747_v62  ;;  %v588_v13 = vsel %vm2697_vm10, %v2648_v52, %v584_v42  ;;  %v541_v58 = vmul.f32 %v2690_v40, %v540_v44  ;;  %v828_v59 = vpop.xlane.xlu2 %827  ;;  %v825_v3 = vpop.xlane.xlu1 %824  ;;  %v749_v48 = vpack.c.bf16 %v733_v27, %v733_v27  ;;  %vm566_vm15 = vweird.f32 %v2703_v57  ;;  %vm2751_vm3 = vmor %vm545_vm11, %vm546_vm14 }
 0x148   : > { %v2724_v55 = vpop.eup %1906  ;;  %v694_v46 = vmul.f32 %v588_v13, %v2273_v19  ;;  %v561_v23 = vmul.f32 %v2703_v57, %v560_v10  ;;  %vm535_vm1 = vweird.f32 %v2687_v9  ;;  %v2733_v21 = vsub.f32 %v2323_v28, %v852_v17  ;;  %vm2764_vm4 = vmor %vm565_vm12, %vm566_vm15 }
 0x149   : > { %v542_v25 = vmul.f32 0.5, %v541_v58  ;;  %v550_v52 = vmul.f32 %v2724_v55, %v2675_v11  ;;  %1320 = vmatpush.bf16.xpose.msra.mxu0 %v1310_v50  ;;  %1835 = vmatpush.bf16.xpose.msra.mxu2 %v1310_v50  ;;  %v859_v4 = vmul.f32 %v828_v59, %v2166_v38  ;;  %v1829_v54 = vld [vmem:[#allocation2 + $0x20] sm:$0xff]  ;;  %766 = vst.msk [vmem:[#allocation2 + $0x18] sm:$0xf] %vm759_vm5, %v749_v48  ;;  %vm556_vm2 = vweird.f32 %v2724_v55 }
 0x14a   : > { %v713_v19 = vmul.f32 %v2386_v39, %v694_v46  ;;  %v562_v41 = vmul.f32 0.5, %v561_v23  ;;  %v883_v31 = vmul.f32 %v2722_v63, %v2722_v63  ;;  %v858_v32 = vmul.f32 %v825_v3, %v2166_v38  ;;  %vm2789_vm6 = vmor %vm555_vm13, %vm556_vm2 }
 0x14b   : > { %v543_v34 = vsub.f32 1.5, %v542_v25  ;;  %v551_v43 = vmul.f32 %v2724_v55, %v550_v52  ;;  %v2744_v28 = vsub.f32 %v2331_v33, %v859_v4  ;;  %v1307_v37 = vsel %vm345_vm0, %v1829_v54, 0 }
 0x14c   : > { %v1909_v18 = vpop.eup %1908  ;;  %v732_v60 = vadd.f32 %v2398_v14, %v713_v19  ;;  %v563_v26 = vsub.f32 1.5, %v562_v41  ;;  %v905_v7 = vsel %vm345_vm0, %v883_v31, 0.0  ;;  %v2757_v30 = vsub.f32 %v2334_v12, %v858_v32 }
 0x14d   : > { %v544_v33 = vmul.f32 %v2690_v40, %v543_v34  ;;  %v552_v61 = vmul.f32 0.5, %v551_v43  ;;  %v530_v15 = vmul.f32 %v1909_v18, %v2687_v9  ;;  %906 = vadd.xlane.f32.xlu1 %v905_v7  ;;  %v891_v42 = vmul.f32 %v2744_v28, %v2744_v28 }
 0x14e   : > { %v748_v62 = vpack.c.bf16 %v732_v60, %v732_v60  ;;  %v564_v12 = vmul.f32 %v2703_v57, %v563_v26  ;;  %v884_v44 = vmul.f32 %v2733_v21, %v2733_v21  ;;  %v890_v10 = vmul.f32 %v2757_v30, %v2757_v30 }
 0x14f   : > { %v548_v6 = vsel %vm2751_vm3, %v2690_v40, %v544_v33  ;;  %v553_v17 = vsub.f32 1.5, %v552_v61  ;;  %v531_v27 = vmul.f32 %v1909_v18, %v530_v15  ;;  %v810_v50 = vpop.xlane.xlu1 %809  ;;  %vm536_vm7 = vweird.f32 %v1909_v18 }
 0x150   : > { %765 = vst.msk [vmem:[#allocation2 + $0x14] sm:$0xf] %vm759_vm5, %v748_v62  ;;  %v690_v13 = vmul.f32 %v548_v6, %v2300_v1  ;;  %v568_v58 = vsel %vm2764_vm4, %v2703_v57, %v564_v12  ;;  %v929_v59 = vsel %vm345_vm0, %v891_v42, 0.0  ;;  %v926_v57 = vsel %vm345_vm0, %v890_v10, 0.0  ;;  %v1828_v25 = vld [vmem:[#allocation2 + $0x18] sm:$0xff]  ;;  %vm537_vm8 = vmor %vm535_vm1, %vm536_vm7 }
 0x151   : > { %v692_v3 = vmul.f32 %v568_v58, %v2291_v0  ;;  %v554_v48 = vmul.f32 %v2724_v55, %v553_v17  ;;  %v532_v1 = vmul.f32 0.5, %v531_v27  ;;  %1321 = vmatpush.bf16.xpose.msra.mxu0 %v1307_v37  ;;  %1836 = vmatpush.bf16.xpose.msra.mxu2 %v1307_v37  ;;  %v908_v11 = vsel %vm345_vm0, %v884_v44, 0.0 }
 0x152   : > { %v709_v46 = vmul.f32 %v2386_v39, %v690_v13  ;;  %930 = vadd.xlane.f32.xlu0 %v929_v59  ;;  %927 = vadd.xlane.f32.xlu2 %v926_v57  ;;  %v853_v23 = vmul.f32 %v810_v50, %v2166_v38 }
 0x153   : > { %v711_v52 = vmul.f32 %v2386_v39, %v692_v3  ;;  %v558_v0 = vsel %vm2789_vm6, %v2724_v55, %v554_v48  ;;  %v533_v4 = vsub.f32 1.5, %v532_v1  ;;  %v1304_v55 = vsel %vm345_vm0, %v1828_v25, 0 }
 0x154   : > { %v728_v54 = vadd.f32 %v2398_v14, %v709_v46  ;;  %v691_v19 = vmul.f32 %v558_v0, %v2294_v2  ;;  %v2810_v41 = vsub.f32 %v2341_v35, %v853_v23 }
 0x155   : > { %v730_v31 = vadd.f32 %v2398_v14, %v711_v52  ;;  %v534_v32 = vmul.f32 %v1909_v18, %v533_v4  ;;  %909 = vadd.xlane.f32.xlu1 %v908_v11 }
 0x156   : > { %v744_v34 = vpack.c.bf16 %v728_v54, %v728_v54  ;;  %v710_v43 = vmul.f32 %v2386_v39, %v691_v19  ;;  %v885_v60 = vmul.f32 %v2810_v41, %v2810_v41 }
 0x157   : > { %v746_v2 = vpack.c.bf16 %v730_v31, %v730_v31  ;;  %v538_v5 = vsel %vm537_vm8, %v1909_v18, %v534_v32  ;;  %v831_v26 = vpop.xlane.xlu1 %830  ;;  %v1827_v15 = vld [vmem:[#allocation2 + $0x10] sm:$0xff] }
 0x158   : > { %761 = vst.msk [vmem:[#allocation2 + $0x4] sm:$0xf] %vm759_vm5, %v744_v34  ;;  %v729_v35 = vadd.f32 %v2398_v14, %v710_v43  ;;  %v689_v9 = vmul.f32 %v538_v5, %v2312_v8  ;;  %v911_v7 = vsel %vm345_vm0, %v885_v60, 0.0  ;;  %v860_v33 = vmul.f32 %v831_v26, %v2166_v38 }
 0x159   : > { %763 = vst.msk [vmem:[#allocation2 + $0xc] sm:$0xf] %vm759_vm5, %v746_v2  ;;  %1322 = vmatpush.bf16.xpose.msra.mxu0 %v1304_v55  ;;  %1837 = vmatpush.bf16.xpose.msra.mxu2 %v1304_v55  ;;  %v1301_v12 = vsel %vm345_vm0, %v1827_v15, 0 }
 0x15a   : > { %v745_v53 = vpack.c.bf16 %v729_v35, %v729_v35  ;;  %v708_v61 = vmul.f32 %v2386_v39, %v689_v9  ;;  %912 = vadd.xlane.f32.xlu2 %v911_v7  ;;  %v2825_v18 = vsub.f32 %v2346_v36, %v860_v33 }
 0x15c   : > { %762 = vst.msk [vmem:[#allocation2 + $0x8] sm:$0xf] %vm759_vm5, %v745_v53  ;;  %v727_v8 = vadd.f32 %v2398_v14, %v708_v61  ;;  %v892_v37 = vmul.f32 %v2825_v18, %v2825_v18 }
 0x15e   : > { %v743_v62 = vpack.c.bf16 %v727_v8, %v727_v8  ;;  %v932_v42 = vsel %vm345_vm0, %v892_v37, 0.0 }
 0x15f   : > { %933 = vadd.xlane.f32.xlu0 %v932_v42 }
 0x160   : > { %760 = vst.msk [vmem:[#allocation2] sm:$0xf] %vm759_vm5, %v743_v62 }
 0x161   : > { %1323 = vmatpush.bf16.xpose.msra.mxu0 %v1301_v12  ;;  %1838 = vmatpush.bf16.xpose.msra.mxu2 %v1301_v12 }
 0x163   : > { %v1826_v36 = vld [vmem:[#allocation2 + $0x8] sm:$0xff] }
 0x164   : > { %v1298_v44 = vsel %vm345_vm0, %v1826_v36, 0 }
 0x167   : > { %v1825_v6 = vld [vmem:[#allocation2] sm:$0xff] }
 0x168   : > { %v1295_v17 = vsel %vm345_vm0, %v1825_v6, 0 }
 0x169   : > { %1324 = vmatpush.bf16.xpose.msra.mxu0 %v1298_v44  ;;  %1839 = vmatpush.bf16.xpose.msra.mxu2 %v1298_v44 }
 0x171   : > { %1325 = vmatpush.bf16.xpose.msra.mxu0 %v1295_v17  ;;  %1840 = vmatpush.bf16.xpose.msra.mxu2 %v1295_v17 }
 0x183   : > { %v916_v27 = vpop.xlane.xlu2 %915 }
 0x184   : > { %v950_v10 = vmul.f32 %v916_v27, %v2166_v38 }
 0x186   : > { %v966_v50 = vadd.f32 1e-05, %v950_v10 }
 0x188   : > { %1910 = vrsqrt.f32 %v966_v50  ;;  %vm1042_vm5 = vweird.f32 %v966_v50 }
 0x18b   : > { %v834_v13 = vpop.xlane.xlu2 %833 }
 0x18c   : > { %v861_v58 = vmul.f32 %v834_v13, %v2166_v38 }
 0x18e   : > { %v1911_v40 = vpop.eup %1910  ;;  %v2839_v59 = vsub.f32 %v2378_v29, %v861_v58 }
 0x18f   : > { %v1037_v3 = vmul.f32 %v1911_v40, %v966_v50  ;;  %vm1043_vm9 = vweird.f32 %v1911_v40 }
 0x190   : > { %v893_v48 = vmul.f32 %v2839_v59, %v2839_v59  ;;  %vm1044_vm10 = vmor %vm1042_vm5, %vm1043_vm9 }
 0x191   : > { %v1038_v1 = vmul.f32 %v1911_v40, %v1037_v3 }
 0x192   : > { %v935_v57 = vsel %vm345_vm0, %v893_v48, 0.0 }
 0x193   : > { %936 = vadd.xlane.f32.xlu1 %v935_v57  ;;  %v1039_v23 = vmul.f32 0.5, %v1038_v1 }
 0x194   : > { %v919_v46 = vpop.xlane.xlu0 %918 }
 0x195   : > { %v951_v11 = vmul.f32 %v919_v46, %v2166_v38  ;;  %v1040_v52 = vsub.f32 1.5, %v1039_v23 }
 0x197   : > { %v967_v25 = vadd.f32 1e-05, %v951_v11  ;;  %v1041_v4 = vmul.f32 %v1911_v40, %v1040_v52 }
 0x199   : > { %1912 = vrsqrt.f32 %v967_v25  ;;  %v1045_v32 = vsel %vm1044_vm10, %v1911_v40, %v1041_v4  ;;  %vm1052_vm11 = vweird.f32 %v967_v25 }
 0x19a   : > { %v901_v0 = vpop.xlane.xlu1 %900  ;;  %v1142_v2 = vmul.f32 %v1045_v32, %v2359_v20 }
 0x19b   : > { %v945_v29 = vmul.f32 %v901_v0, %v2166_v38 }
 0x19c   : > { %v1161_v8 = vmul.f32 %v2386_v39, %v1142_v2 }
 0x19d   : > { %v961_v54 = vadd.f32 1e-05, %v945_v29 }
 0x19e   : > { %v1180_v6 = vadd.f32 %v2398_v14, %v1161_v8 }
 0x19f   : > { %v1913_v19 = vpop.eup %1912  ;;  %1914 = vrsqrt.f32 %v961_v54  ;;  %vm992_vm15 = vweird.f32 %v961_v54 }
 0x1a0   : > { %v1047_v31 = vmul.f32 %v1913_v19, %v967_v25  ;;  %vm1053_vm12 = vweird.f32 %v1913_v19  ;;  %v1196_v58 = vmul.f32 0.17677669, %v1180_v6 }
 0x1a1   : > { %vm1054_vm13 = vmor %vm1052_vm11, %vm1053_vm12 }
 0x1a2   : > { %v1048_v34 = vmul.f32 %v1913_v19, %v1047_v31  ;;  %v837_v43 = vpop.xlane.xlu1 %836 }
 0x1a3   : > { %v862_v60 = vmul.f32 %v837_v43, %v2166_v38 }
 0x1a4   : > { %v1049_v55 = vmul.f32 0.5, %v1048_v34 }
 0x1a5   : > { %v1915_v5 = vpop.eup %1914  ;;  %v2849_v35 = vsub.f32 %v2498_v51, %v862_v60 }
 0x1a6   : > { %v1050_v26 = vsub.f32 1.5, %v1049_v55  ;;  %v987_v9 = vmul.f32 %v1915_v5, %v961_v54  ;;  %v898_v7 = vpop.xlane.xlu0 %897  ;;  %vm993_vm14 = vweird.f32 %v1915_v5 }
 0x1a7   : > { %v944_v53 = vmul.f32 %v898_v7, %v2166_v38  ;;  %v894_v61 = vmul.f32 %v2849_v35, %v2849_v35  ;;  %vm994_vm1 = vmor %vm992_vm15, %vm993_vm14 }
 0x1a8   : > { %v1051_v33 = vmul.f32 %v1913_v19, %v1050_v26  ;;  %v988_v15 = vmul.f32 %v1915_v5, %v987_v9 }
 0x1a9   : > { %v960_v62 = vadd.f32 1e-05, %v944_v53  ;;  %v938_v20 = vsel %vm345_vm0, %v894_v61, 0.0 }
 0x1aa   : > { %v1055_v37 = vsel %vm1054_vm13, %v1913_v19, %v1051_v33  ;;  %v989_v51 = vmul.f32 0.5, %v988_v15  ;;  %939 = vadd.xlane.f32.xlu2 %v938_v20 }
 0x1ab   : > { %v1143_v12 = vmul.f32 %v1055_v37, %v2413_v56  ;;  %1916 = vrsqrt.f32 %v960_v62  ;;  %v922_v42 = vpop.xlane.xlu2 %921  ;;  %vm982_vm2 = vweird.f32 %v960_v62 }
 0x1ac   : > { %v952_v36 = vmul.f32 %v922_v42, %v2166_v38  ;;  %v990_v17 = vsub.f32 1.5, %v989_v51 }
 0x1ad   : > { %v1162_v44 = vmul.f32 %v2386_v39, %v1143_v12 }
 0x1ae   : > { %v968_v27 = vadd.f32 1e-05, %v952_v36  ;;  %v925_v10 = vpop.xlane.xlu0 %924  ;;  %v991_v3 = vmul.f32 %v1915_v5, %v990_v17 }
 0x1af   : > { %v1181_v50 = vadd.f32 %v2398_v14, %v1162_v44  ;;  %v953_v13 = vmul.f32 %v925_v10, %v2166_v38 }
 0x1b0   : > { %1918 = vrsqrt.f32 %v968_v27  ;;  %v995_v23 = vsel %vm994_vm1, %v1915_v5, %v991_v3  ;;  %vm1062_vm5 = vweird.f32 %v968_v27 }
 0x1b1   : > { %v1197_v56 = vmul.f32 0.17677669, %v1181_v50  ;;  %v1917_v40 = vpop.eup %1916  ;;  %v969_v48 = vadd.f32 1e-05, %v953_v13  ;;  %v1137_v31 = vmul.f32 %v995_v23, %v2429_v16 }
 0x1b2   : > { %v977_v1 = vmul.f32 %v1917_v40, %v960_v62  ;;  %vm983_vm3 = vweird.f32 %v1917_v40 }
 0x1b3   : > { %v1209_v57 = vpack.c.bf16 %v1197_v56, %v1196_v58  ;;  %1920 = vrsqrt.f32 %v969_v48  ;;  %v840_v11 = vpop.xlane.xlu2 %839  ;;  %vm984_vm4 = vmor %vm982_vm2, %vm983_vm3  ;;  %v1156_v16 = vmul.f32 %v2386_v39, %v1137_v31  ;;  %vm1072_vm7 = vweird.f32 %v969_v48  ;;  %v2886_v56 = vld [vmem:[%s3118_s3] ss:$0 sm:$0xff] }
 0x1b4   : > { %v978_v46 = vmul.f32 %v1917_v40, %v977_v1  ;;  %v863_v25 = vmul.f32 %v840_v11, %v2166_v38 }
 0x1b5   : > { %1814 = vmatmul.msk.bf16.vlgmr.msra.gmra.mxu2 %vm345_vm0, %v1209_v57  ;;  %v1175_v12 = vadd.f32 %v2398_v14, %v1156_v16  ;;  %v2895_v57 = vld [vmem:[%s3119_s4] ss:$0 sm:$0xff] }
 0x1b6   : > { %v1919_v52 = vpop.eup %1918  ;;  %v979_v0 = vmul.f32 0.5, %v978_v46  ;;  %v904_v29 = vpop.xlane.xlu0 %903  ;;  %v2865_v19 = vsub.f32 %v2534_v45, %v863_v25 }
 0x1b7   : > { %v1057_v4 = vmul.f32 %v1919_v52, %v968_v27  ;;  %v946_v54 = vmul.f32 %v904_v29, %v2166_v38  ;;  %vm1063_vm6 = vweird.f32 %v1919_v52  ;;  %v1191_v58 = vmul.f32 0.17677669, %v1175_v12 }
 0x1b8   : > { %v980_v32 = vsub.f32 1.5, %v979_v0  ;;  %v895_v60 = vmul.f32 %v2865_v19, %v2865_v19  ;;  %vm1064_vm9 = vmor %vm1062_vm5, %vm1063_vm6 }
 0x1b9   : > { %v1921_v34 = vpop.eup %1920  ;;  %v1058_v43 = vmul.f32 %v1919_v52, %v1057_v4  ;;  %v2869_v55 = vadd.f32 1e-05, %v946_v54 }
 0x1ba   : > { %v981_v2 = vmul.f32 %v1917_v40, %v980_v32  ;;  %v1067_v5 = vmul.f32 %v1921_v34, %v969_v48  ;;  %v941_v45 = vsel %vm345_vm0, %v895_v60, 0.0  ;;  %vm1073_vm8 = vweird.f32 %v1921_v34 }
 0x1bb   : > { %v1059_v26 = vmul.f32 0.5, %v1058_v43  ;;  %1922 = vrsqrt.f32 %v2869_v55  ;;  %942 = vadd.xlane.f32.xlu0 %v941_v45  ;;  %vm1074_vm10 = vmor %vm1072_vm7, %vm1073_vm8  ;;  %vm1002_vm11 = vweird.f32 %v2869_v55 }
 0x1bc   : > { %v985_v9 = vsel %vm984_vm4, %v1917_v40, %v981_v2  ;;  %v1068_v7 = vmul.f32 %v1921_v34, %v1067_v5 }
 0x1bd   : > { %v1136_v33 = vmul.f32 %v985_v9, %v2548_v22  ;;  %v1060_v53 = vsub.f32 1.5, %v1059_v26 }
 0x1be   : > { %v1069_v61 = vmul.f32 0.5, %v1068_v7 }
 0x1bf   : > { %v1061_v15 = vmul.f32 %v1919_v52, %v1060_v53  ;;  %v1155_v37 = vmul.f32 %v2386_v39, %v1136_v33 }
 0x1c0   : > { %v907_v8 = vpop.xlane.xlu1 %906  ;;  %v1070_v62 = vsub.f32 1.5, %v1069_v61 }
 0x1c1   : > { %v947_v20 = vmul.f32 %v907_v8, %v2166_v38  ;;  %v1923_v51 = vpop.eup %1922  ;;  %v1065_v42 = vsel %vm1064_vm9, %v1919_v52, %v1061_v15  ;;  %v1174_v22 = vadd.f32 %v2398_v14, %v1155_v37 }
 0x1c2   : > { %v1144_v36 = vmul.f32 %v1065_v42, %v2576_v24  ;;  %v1071_v44 = vmul.f32 %v1921_v34, %v1070_v62  ;;  %v997_v6 = vmul.f32 %v1923_v51, %v2869_v55  ;;  %vm1003_vm12 = vweird.f32 %v1923_v51 }
 0x1c3   : > { %v963_v17 = vadd.f32 1e-05, %v947_v20  ;;  %v1190_v27 = vmul.f32 0.17677669, %v1174_v22  ;;  %vm2905_vm13 = vmor %vm1002_vm11, %vm1003_vm12 }
 0x1c4   : > { %v1075_v10 = vsel %vm1074_vm10, %v1921_v34, %v1071_v44  ;;  %v998_v39 = vmul.f32 %v1923_v51, %v997_v6  ;;  %v1163_v40 = vmul.f32 %v2886_v56, %v1144_v36 }
 0x1c5   : > { %v931_v50 = vpop.xlane.xlu0 %930  ;;  %v928_v13 = vpop.xlane.xlu2 %927  ;;  %v1145_v14 = vmul.f32 %v1075_v10, %v2482_v49  ;;  %1924 = vrsqrt.f32 %v963_v17  ;;  %v1206_v1 = vpack.c.bf16 %v1191_v58, %v1190_v27  ;;  %vm1012_vm14 = vweird.f32 %v963_v17 }
 0x1c6   : > { %v955_v24 = vmul.f32 %v931_v50, %v2166_v38  ;;  %v999_v3 = vmul.f32 0.5, %v998_v39  ;;  %v954_v48 = vmul.f32 %v928_v13, %v2166_v38  ;;  %v1182_v46 = vadd.f32 %v2895_v57, %v1163_v40 }
 0x1c7   : > { %v1164_v49 = vmul.f32 %v2886_v56, %v1145_v14  ;;  %1811 = vmatmul.msk.bf16.vlgmr.msra.gmra.mxu0 %vm345_vm0, %v1206_v1 }
 0x1c8   : > { %v971_v11 = vadd.f32 1e-05, %v955_v24  ;;  %v910_v23 = vpop.xlane.xlu1 %909  ;;  %v1000_v25 = vsub.f32 1.5, %v999_v3  ;;  %v970_v52 = vadd.f32 1e-05, %v954_v48 }
 0x1c9   : > { %v948_v0 = vmul.f32 %v910_v23, %v2166_v38  ;;  %v1183_v29 = vadd.f32 %v2895_v57, %v1164_v49  ;;  %v1198_v4 = vmul.f32 0.17677669, %v1182_v46 }
 0x1ca   : > { %1926 = vrsqrt.f32 %v971_v11  ;;  %v1001_v54 = vmul.f32 %v1923_v51, %v1000_v25  ;;  %vm1092_vm2 = vweird.f32 %v971_v11  ;;  %vm1082_vm4 = vweird.f32 %v970_v52 }
 0x1cb   : > { %1928 = vrsqrt.f32 %v970_v52  ;;  %v964_v31 = vadd.f32 1e-05, %v948_v0  ;;  %v1925_v32 = vpop.eup %1924  ;;  %v1199_v43 = vmul.f32 0.17677669, %v1183_v29 }
 0x1cc   : > { %v1007_v60 = vmul.f32 %v1925_v32, %v963_v17  ;;  %v1005_v45 = vsel %vm2905_vm13, %v1923_v51, %v1001_v54  ;;  %vm1013_vm15 = vweird.f32 %v1925_v32 }
 0x1cd   : > { %1930 = vrsqrt.f32 %v964_v31  ;;  %v913_v2 = vpop.xlane.xlu2 %912  ;;  %v1210_v26 = vpack.c.bf16 %v1199_v43, %v1198_v4  ;;  %v1138_v61 = vmul.f32 %v1005_v45, %v2597_v47  ;;  %vm2914_vm1 = vmor %vm1012_vm14, %vm1013_vm15  ;;  %vm1022_vm7 = vweird.f32 %v964_v31 }
 0x1ce   : > { %v949_v5 = vmul.f32 %v913_v2, %v2166_v38  ;;  %v1008_v9 = vmul.f32 %v1925_v32, %v1007_v60 }
 0x1cf   : > { %1815 = vmatmul.msk.bf16.gmra.mxu2 %vm345_vm0, %v1210_v26  ;;  %v1157_v47 = vmul.f32 %v2886_v56, %v1138_v61 }
 0x1d0   : > { %v1927_v7 = vpop.eup %1926  ;;  %v965_v16 = vadd.f32 1e-05, %v949_v5  ;;  %v1009_v33 = vmul.f32 0.5, %v1008_v9 }
 0x1d1   : > { %v1929_v55 = vpop.eup %1928  ;;  %v1087_v53 = vmul.f32 %v1927_v7, %v971_v11  ;;  %vm1093_vm3 = vweird.f32 %v1927_v7  ;;  %v1176_v3 = vadd.f32 %v2895_v57, %v1157_v47 }
 0x1d2   : > { %v1077_v15 = vmul.f32 %v1929_v55, %v970_v52  ;;  %1932 = vrsqrt.f32 %v965_v16  ;;  %v1010_v37 = vsub.f32 1.5, %v1009_v33  ;;  %vm1083_vm6 = vweird.f32 %v1929_v55  ;;  %vm1094_vm8 = vmor %vm1092_vm2, %vm1093_vm3 }
 0x1d3   : > { %v1931_v8 = vpop.eup %1930  ;;  %v1088_v62 = vmul.f32 %v1927_v7, %v1087_v53  ;;  %vm1084_vm9 = vmor %vm1082_vm4, %vm1083_vm6  ;;  %vm1032_vm11 = vweird.f32 %v965_v16  ;;  %v1192_v29 = vmul.f32 0.17677669, %v1176_v3  ;;  %v934_v53 = vpop.xlane.xlu0 %933 }
 0x1d4   : > { %v1078_v12 = vmul.f32 %v1929_v55, %v1077_v15  ;;  %v1017_v51 = vmul.f32 %v1931_v8, %v964_v31  ;;  %v1011_v42 = vmul.f32 %v1925_v32, %v1010_v37  ;;  %vm1023_vm5 = vweird.f32 %v1931_v8 }
 0x1d5   : > { %v1089_v22 = vmul.f32 0.5, %v1088_v62  ;;  %vm2927_vm10 = vmor %vm1022_vm7, %vm1023_vm5 }
 0x1d6   : > { %v1079_v36 = vmul.f32 0.5, %v1078_v12  ;;  %v1018_v44 = vmul.f32 %v1931_v8, %v1017_v51  ;;  %v1015_v6 = vsel %vm2914_vm1, %v1925_v32, %v1011_v42 }
 0x1d7   : > { %v1090_v17 = vsub.f32 1.5, %v1089_v22  ;;  %v1139_v10 = vmul.f32 %v1015_v6, %v2722_v63 }
 0x1d8   : > { %v1933_v27 = vpop.eup %1932  ;;  %v1080_v39 = vsub.f32 1.5, %v1079_v36  ;;  %v1019_v50 = vmul.f32 0.5, %v1018_v44 }
 0x1d9   : > { %v1091_v13 = vmul.f32 %v1927_v7, %v1090_v17  ;;  %v1027_v58 = vmul.f32 %v1933_v27, %v965_v16  ;;  %v1158_v24 = vmul.f32 %v2886_v56, %v1139_v10  ;;  %vm1033_vm12 = vweird.f32 %v1933_v27 }
 0x1da   : > { %v1081_v40 = vmul.f32 %v1929_v55, %v1080_v39  ;;  %v1020_v14 = vsub.f32 1.5, %v1019_v50  ;;  %vm1034_vm13 = vmor %vm1032_vm11, %vm1033_vm12 }
 0x1db   : > { %v1095_v48 = vsel %vm1094_vm8, %v1927_v7, %v1091_v13  ;;  %v1028_v63 = vmul.f32 %v1933_v27, %v1027_v58  ;;  %v1177_v49 = vadd.f32 %v2895_v57, %v1158_v24 }
 0x1dc   : > { %v1147_v46 = vmul.f32 %v1095_v48, %v2744_v28  ;;  %v1085_v11 = vsel %vm1084_vm9, %v1929_v55, %v1081_v40  ;;  %v1021_v23 = vmul.f32 %v1931_v8, %v1020_v14 }
 0x1dd   : > { %v1146_v25 = vmul.f32 %v1085_v11, %v2757_v30  ;;  %v1029_v52 = vmul.f32 0.5, %v1028_v63  ;;  %v1193_v4 = vmul.f32 0.17677669, %v1177_v49 }
 0x1de   : > { %v1025_v0 = vsel %vm2927_vm10, %v1931_v8, %v1021_v23  ;;  %v1166_v32 = vmul.f32 %v2886_v56, %v1147_v46  ;;  %v956_v8 = vmul.f32 %v934_v53, %v2166_v38 }
 0x1df   : > { %v1030_v54 = vsub.f32 1.5, %v1029_v52  ;;  %v1165_v31 = vmul.f32 %v2886_v56, %v1146_v25  ;;  %v1140_v28 = vmul.f32 %v1025_v0, %v2733_v21  ;;  %v1207_v34 = vpack.c.bf16 %v1193_v4, %v1192_v29 }
 0x1e0   : > { %v1185_v60 = vadd.f32 %v2895_v57, %v1166_v32 }
 0x1e1   : > { %v1031_v43 = vmul.f32 %v1933_v27, %v1030_v54  ;;  %v1184_v30 = vadd.f32 %v2895_v57, %v1165_v31  ;;  %1812 = vmatmul.msk.bf16.gmra.mxu0 %vm345_vm0, %v1207_v34  ;;  %v1159_v9 = vmul.f32 %v2886_v56, %v1140_v28 }
 0x1e2   : > { %v1201_v26 = vmul.f32 0.17677669, %v1185_v60 }
 0x1e3   : > { %v1035_v2 = vsel %vm1034_vm13, %v1933_v27, %v1031_v43  ;;  %v1200_v5 = vmul.f32 0.17677669, %v1184_v30  ;;  %v1178_v21 = vadd.f32 %v2895_v57, %v1159_v9 }
 0x1e4   : > { %v1141_v45 = vmul.f32 %v1035_v2, %v2810_v41  ;;  %v972_v41 = vadd.f32 1e-05, %v956_v8 }
 0x1e5   : > { %v1211_v7 = vpack.c.bf16 %v1201_v26, %v1200_v5  ;;  %v1194_v61 = vmul.f32 0.17677669, %v1178_v21 }
 0x1e6   : > { %v1160_v16 = vmul.f32 %v2886_v56, %v1141_v45  ;;  %1934 = vrsqrt.f32 %v972_v41  ;;  %vm1102_vm14 = vweird.f32 %v972_v41 }
 0x1e7   : > { %1816 = vmatmul.msk.bf16.gmra.mxu2 %vm345_vm0, %v1211_v7 }
 0x1e8   : > { %v1179_v55 = vadd.f32 %v2895_v57, %v1160_v16 }
 0x1ea   : > { %v1195_v33 = vmul.f32 0.17677669, %v1179_v55 }
 0x1ec   : > { %v1208_v15 = vpack.c.bf16 %v1195_v33, %v1194_v61  ;;  %v1935_v37 = vpop.eup %1934 }
 0x1ed   : > { %v1097_v62 = vmul.f32 %v1935_v37, %v972_v41  ;;  %vm1103_vm15 = vweird.f32 %v1935_v37 }
 0x1ee   : > { %vm1104_vm1 = vmor %vm1102_vm14, %vm1103_vm15 }
 0x1ef   : > { %v1098_v20 = vmul.f32 %v1935_v37, %v1097_v62 }
 0x1f1   : > { %1813 = vmatmul.msk.bf16.gmra.mxu0 %vm345_vm0, %v1208_v15  ;;  %v1099_v42 = vmul.f32 0.5, %v1098_v20 }
 0x1f3   : > { %v1100_v36 = vsub.f32 1.5, %v1099_v42 }
 0x1f5   : > { %v1101_v44 = vmul.f32 %v1935_v37, %v1100_v36  ;;  %v1540_v36 = vld [vmem:[%s3004_s14 + $0x68] sm:$0xff] }
 0x1f7   : > { %v1105_v17 = vsel %vm1104_vm1, %v1935_v37, %v1101_v44 }
 0x1f8   : > { %v1148_v39 = vmul.f32 %v1105_v17, %v2825_v18  ;;  %v1535_v17 = vld [vmem:[%s3004_s14 + $0x40] sm:$0xff] }
 0x1fa   : > { %v1167_v58 = vmul.f32 %v2886_v56, %v1148_v39 }
 0x1fc   : > { %v1186_v1 = vadd.f32 %v2895_v57, %v1167_v58 }
 0x1fe   : > { %v1202_v18 = vmul.f32 0.17677669, %v1186_v1  ;;  %v1530_v1 = vld [vmem:[%s3004_s14 + $0x18] sm:$0xff] }
 0x206   : > { %v937_v12 = vpop.xlane.xlu1 %936 }
 0x207   : > { %v957_v51 = vmul.f32 %v937_v12, %v2166_v38  ;;  %v1541_v12 = vld [vmem:[%s3004_s14 + $0x70] sm:$0xff] }
 0x209   : > { %v973_v22 = vadd.f32 1e-05, %v957_v51  ;;  %v1542_v51 = vld [vmem:[%s3004_s14 + $0x78] sm:$0xff] }
 0x20a   : > { %v1550_v42 = vpack.c.bf16 %v1542_v51, %v1541_v12 }
 0x20b   : > { %1936 = vrsqrt.f32 %v973_v22  ;;  %vm1112_vm2 = vweird.f32 %v973_v22 }
 0x20c   : > { %1551 = vmatpush.bf16.msra.mxu1 %v1550_v42  ;;  %1841 = vmatpush.bf16.msra.mxu3 %v1550_v42 }
 0x211   : > { %v1937_v47 = vpop.eup %1936 }
 0x212   : > { %v1107_v6 = vmul.f32 %v1937_v47, %v973_v22  ;;  %vm1113_vm3 = vweird.f32 %v1937_v47  ;;  %v1539_v22 = vld [vmem:[%s3004_s14 + $0x60] sm:$0xff] }
 0x213   : > { %vm1114_vm4 = vmor %vm1112_vm2, %vm1113_vm3  ;;  %v1549_v44 = vpack.c.bf16 %v1540_v36, %v1539_v22 }
 0x214   : > { %v1108_v27 = vmul.f32 %v1937_v47, %v1107_v6  ;;  %v1538_v6 = vld [vmem:[%s3004_s14 + $0x58] sm:$0xff] }
 0x215   : > { %1552 = vmatpush.bf16.msra.mxu1 %v1549_v44  ;;  %1842 = vmatpush.bf16.msra.mxu3 %v1549_v44 }
 0x216   : > { %v1109_v10 = vmul.f32 0.5, %v1108_v27 }
 0x218   : > { %v1110_v50 = vsub.f32 1.5, %v1109_v10  ;;  %v1536_v10 = vld [vmem:[%s3004_s14 + $0x48] sm:$0xff] }
 0x219   : > { %v1547_v39 = vpack.c.bf16 %v1536_v10, %v1535_v17 }
 0x21a   : > { %v1111_v13 = vmul.f32 %v1937_v47, %v1110_v50  ;;  %v1533_v50 = vld [vmem:[%s3004_s14 + $0x30] sm:$0xff] }
 0x21c   : > { %v1115_v40 = vsel %vm1114_vm4, %v1937_v47, %v1111_v13  ;;  %v1537_v47 = vld [vmem:[%s3004_s14 + $0x50] sm:$0xff]  ;;  %v1534_v13 = vld [vmem:[%s3004_s14 + $0x38] sm:$0xff] }
 0x21d   : > { %v1149_v14 = vmul.f32 %v1115_v40, %v2839_v59  ;;  %v940_v24 = vpop.xlane.xlu2 %939  ;;  %v1548_v27 = vpack.c.bf16 %v1538_v6, %v1537_v47  ;;  %v1546_v40 = vpack.c.bf16 %v1534_v13, %v1533_v50 }
 0x21e   : > { %v958_v3 = vmul.f32 %v940_v24, %v2166_v38  ;;  %v1532_v24 = vld [vmem:[%s3004_s14 + $0x28] sm:$0xff] }
 0x21f   : > { %v1168_v48 = vmul.f32 %v2886_v56, %v1149_v14  ;;  %1553 = vmatpush.bf16.msra.mxu1 %v1548_v27  ;;  %1843 = vmatpush.bf16.msra.mxu3 %v1548_v27  ;;  %v1531_v14 = vld [vmem:[%s3004_s14 + $0x20] sm:$0xff] }
 0x220   : > { %v974_v63 = vadd.f32 1e-05, %v958_v3  ;;  %v1545_v3 = vpack.c.bf16 %v1532_v24, %v1531_v14 }
 0x221   : > { %v1187_v46 = vadd.f32 %v2895_v57, %v1168_v48  ;;  %v1529_v48 = vld [vmem:[%s3004_s14 + $0x10] sm:$0xff] }
 0x222   : > { %1938 = vrsqrt.f32 %v974_v63  ;;  %vm1122_vm6 = vweird.f32 %v974_v63 }
 0x223   : > { %v1203_v11 = vmul.f32 0.17677669, %v1187_v46  ;;  %1554 = vmatpush.bf16.msra.mxu1 %v1547_v39  ;;  %1844 = vmatpush.bf16.msra.mxu3 %v1547_v39  ;;  %v1527_v46 = vld [vmem:[%s3004_s14] sm:$0xff] }
 0x225   : > { %v1212_v23 = vpack.c.bf16 %v1203_v11, %v1202_v18  ;;  %v1528_v18 = vld [vmem:[%s3004_s14 + $0x8] sm:$0xff] }
 0x227   : > { %1817 = vmatmul.msk.bf16.gmra.mxu2 %vm345_vm0, %v1212_v23  ;;  %1555 = vmatpush.bf16.msra.mxu1 %v1546_v40  ;;  %v1543_v23 = vpack.c.bf16 %v1528_v18, %v1527_v46 }
 0x228   : > { %v1939_v49 = vpop.eup %1938  ;;  %1845 = vmatpush.bf16.msra.mxu3 %v1546_v40 }
 0x229   : > { %v1117_v25 = vmul.f32 %v1939_v49, %v974_v63  ;;  %vm1123_vm7 = vweird.f32 %v1939_v49  ;;  %v1544_v63 = vpack.c.bf16 %v1530_v1, %v1529_v48 }
 0x22a   : > { %vm1124_vm8 = vmor %vm1122_vm6, %vm1123_vm7 }
 0x22b   : > { %v1118_v52 = vmul.f32 %v1939_v49, %v1117_v25  ;;  %1556 = vmatpush.bf16.msra.mxu1 %v1545_v3 }
 0x22c   : > { %1846 = vmatpush.bf16.msra.mxu3 %v1545_v3 }
 0x22d   : > { %v1119_v29 = vmul.f32 0.5, %v1118_v52 }
 0x22e   : > { %v943_v59 = vpop.xlane.xlu0 %942 }
 0x22f   : > { %v959_v0 = vmul.f32 %v943_v59, %v2166_v38  ;;  %v1120_v54 = vsub.f32 1.5, %v1119_v29  ;;  %1557 = vmatpush.bf16.msra.mxu1 %v1544_v63 }
 0x230   : > { %1847 = vmatpush.bf16.msra.mxu3 %v1544_v63 }
 0x231   : > { %v975_v4 = vadd.f32 1e-05, %v959_v0  ;;  %v1121_v31 = vmul.f32 %v1939_v49, %v1120_v54 }
 0x233   : > { %1940 = vrsqrt.f32 %v975_v4  ;;  %v1125_v34 = vsel %vm1124_vm8, %v1939_v49, %v1121_v31  ;;  %vm1132_vm9 = vweird.f32 %v975_v4  ;;  %1558 = vmatpush.bf16.msra.mxu1 %v1543_v23 }
 0x234   : > { %v1150_v60 = vmul.f32 %v1125_v34, %v2849_v35  ;;  %1848 = vmatpush.bf16.msra.mxu3 %v1543_v23 }
 0x236   : > { %v1169_v38 = vmul.f32 %v2886_v56, %v1150_v60 }
 0x238   : > { %v2962_v45 = vpop.f32.mrf.mxu2  ;;  %v1188_v35 = vadd.f32 %v2895_v57, %v1169_v38 }
 0x239   : > { %v1941_v32 = vpop.eup %1940 }
 0x23a   : > { %v1127_v28 = vmul.f32 %v1941_v32, %v975_v4  ;;  %vm1133_vm5 = vweird.f32 %v1941_v32  ;;  %v1204_v55 = vmul.f32 0.17677669, %v1188_v35 }
 0x23b   : > { %vm1134_vm10 = vmor %vm1132_vm9, %vm1133_vm5 }
 0x23c   : > { %v1128_v43 = vmul.f32 %v1941_v32, %v1127_v28 }
 0x23e   : > { %v1129_v30 = vmul.f32 0.5, %v1128_v43 }
 0x240   : > { %v1130_v2 = vsub.f32 1.5, %v1129_v30  ;;  %v2974_v15 = vpop.f32.mrf.mxu2 }
 0x242   : > { %v1131_v5 = vmul.f32 %v1941_v32, %v1130_v2 }
 0x244   : > { %v1135_v26 = vsel %vm1134_vm10, %v1941_v32, %v1131_v5  ;;  %v2964_v9 = vpop.f32.mrf.mxu0 }
 0x245   : > { %v1151_v7 = vmul.f32 %v1135_v26, %v2865_v19  ;;  %1367 = vmax.xlane.f32.xlu1 %v2964_v9 }
 0x247   : > { %v1170_v16 = vmul.f32 %v2886_v56, %v1151_v7 }
 0x249   : > { %v1189_v21 = vadd.f32 %v2895_v57, %v1170_v16 }
 0x24b   : > { %v1205_v33 = vmul.f32 0.17677669, %v1189_v21 }
 0x24c   : > { %v2971_v53 = vpop.f32.mrf.mxu0 }
 0x24d   : > { %1369 = vmax.xlane.f32.xlu2 %v2971_v53  ;;  %v1213_v61 = vpack.c.bf16 %v1205_v33, %v1204_v55 }
 0x24f   : > { %1818 = vmatmul.msk.bf16.gmra.mxu2 %vm345_vm0, %v1213_v61  ;;  %vm1632_vm0 = vcmask 130048  }
 0x252   : > { %v2977_v19 = vpop.f32.mrf.mxu2 }
 0x25a   : > { %v2982_v56 = vpop.f32.mrf.mxu2 }
 0x25e   : > { %v2979_v8 = vpop.f32.mrf.mxu0 }
 0x25f   : > { %1371 = vmax.xlane.f32.xlu0 %v2979_v8 }
 0x266   : > { %v2984_v57 = vpop.f32.mrf.mxu0 }
 0x267   : > { %1373 = vmax.xlane.f32.xlu1 %v2984_v57 }
 0x26a   : > { %v2987_v41 = vpop.f32.mrf.mxu2 }
 0x26b   : > { %1387 = vmax.xlane.f32.xlu2 %v2987_v41 }
 0x26e   : > { %v2990_v37 = vpop.f32.mrf.mxu0 }
 0x26f   : > { %1375 = vmax.xlane.f32.xlu1 %v2990_v37 }
 0x272   : > { %v2993_v62 = vpop.f32.mrf.mxu2 }
 0x273   : > { %1389 = vmax.xlane.f32.xlu0 %v2993_v62 }
 0x276   : > { %v2996_v20 = vpop.f32.mrf.mxu0 }
 0x277   : > { %1377 = vmax.xlane.f32.xlu2 %v2996_v20 }
 0x27f   : > { %1379 = vmax.xlane.f32.xlu2 %v2962_v45 }
 0x2aa   : > { %v3016_v58 = vpop.f32.mrf.mxu2 }
 0x2ab   : > { %1391 = vmax.xlane.f32.xlu0 %v3016_v58 }
 0x2b2   : > { %v3025_v11 = vpop.f32.mrf.mxu2 }
 0x2b3   : > { %1381 = vmax.xlane.f32.xlu0 %v2974_v15  ;;  %1393 = vmax.xlane.f32.xlu1 %v3025_v11 }
 0x2b8   : > { %v1368_v49 = vpop.xlane.xlu1 %1367 }
 0x2b9   : > { %v1399_v52 = vsub.f32 %v2964_v9, %v1368_v49 }
 0x2bb   : > { %1383 = vmax.xlane.f32.xlu0 %v2977_v19 }
 0x2c0   : > { %v1370_v25 = vpop.xlane.xlu2 %1369 }
 0x2c1   : > { %v1400_v59 = vsub.f32 %v2971_v53, %v1370_v25 }
 0x2c3   : > { %v1415_v0 = vpack.c.bf16 %v1400_v59, %v1399_v52 }
 0x2c5   : > { %v1423_v29 = vunpack.c.l.bf16 %v1415_v0  ;;  %v1424_v4 = vunpack.c.h.bf16 %v1415_v0 }
 0x2c7   : > { %v1439_v54 = vmul.f32 1.442695, %v1423_v29  ;;  %v1441_v31 = vmul.f32 1.442695, %v1424_v4 }
 0x2c9   : > { %1942 = vpow2.f32 %v1439_v54 }
 0x2ca   : > { %1944 = vpow2.f32 %v1441_v31 }
 0x2cf   : > { %v1943_v32 = vpop.eup %1942 }
 0x2d0   : > { %v1945_v28 = vpop.eup %1944 }
 0x2d1   : > { %v1471_v34 = vpack.c.bf16 %v1945_v28, %v1943_v32 }
 0x2d2   : > { %v3032_v43 = vpop.f32.mrf.mxu2  ;;  %v1372_v60 = vpop.xlane.xlu0 %1371 }
 0x2d3   : > { %1559 = vmatmul.bf16.vlgmr.msra.gmra.mxu1 %v1471_v34  ;;  %v1480_v30 = vunpack.c.h.bf16 %v1471_v34  ;;  %1395 = vmax.xlane.f32.xlu1 %v3032_v43  ;;  %v1401_v5 = vsub.f32 %v2979_v8, %v1372_v60  ;;  %v1479_v33 = vunpack.c.l.bf16 %v1471_v34 }
 0x2d5   : > { %1497 = vadd.xlane.f32.xlu0 %v1480_v30 }
 0x2da   : > { %v1374_v2 = vpop.xlane.xlu1 %1373  ;;  %v3037_v26 = vpop.f32.mrf.mxu2 }
 0x2db   : > { %v1402_v38 = vsub.f32 %v2984_v57, %v1374_v2  ;;  %1385 = vmax.xlane.f32.xlu1 %v2982_v56  ;;  %1397 = vmax.xlane.f32.xlu2 %v3037_v26 }
 0x2dd   : > { %v1416_v9 = vpack.c.bf16 %v1402_v38, %v1401_v5 }
 0x2de   : > { %v1388_v55 = vpop.xlane.xlu2 %1387 }
 0x2df   : > { %v1425_v7 = vunpack.c.l.bf16 %v1416_v9  ;;  %v1426_v16 = vunpack.c.h.bf16 %v1416_v9  ;;  %v1409_v61 = vsub.f32 %v2987_v41, %v1388_v55 }
 0x2e1   : > { %v1443_v35 = vmul.f32 1.442695, %v1425_v7  ;;  %v1445_v21 = vmul.f32 1.442695, %v1426_v16 }
 0x2e2   : > { %v1376_v57 = vpop.xlane.xlu1 %1375 }
 0x2e3   : > { %1946 = vpow2.f32 %v1443_v35  ;;  %1495 = vadd.xlane.f32.xlu2 %v1479_v33  ;;  %v1403_v47 = vsub.f32 %v2990_v37, %v1376_v57 }
 0x2e4   : > { %1948 = vpow2.f32 %v1445_v21 }
 0x2e6   : > { %v1390_v53 = vpop.xlane.xlu0 %1389 }
 0x2e7   : > { %v1410_v8 = vsub.f32 %v2993_v62, %v1390_v53 }
 0x2e9   : > { %v1420_v12 = vpack.c.bf16 %v1410_v8, %v1409_v61  ;;  %v1947_v51 = vpop.eup %1946 }
 0x2ea   : > { %v1949_v42 = vpop.eup %1948  ;;  %v1378_v44 = vpop.xlane.xlu2 %1377 }
 0x2eb   : > { %v1433_v22 = vunpack.c.l.bf16 %v1420_v12  ;;  %v1434_v36 = vunpack.c.h.bf16 %v1420_v12  ;;  %v1404_v6 = vsub.f32 %v2996_v20, %v1378_v44  ;;  %v1472_v17 = vpack.c.bf16 %v1949_v42, %v1947_v51 }
 0x2ed   : > { %v1459_v27 = vmul.f32 1.442695, %v1433_v22  ;;  %v1461_v10 = vmul.f32 1.442695, %v1434_v36  ;;  %v1417_v39 = vpack.c.bf16 %v1404_v6, %v1403_v47  ;;  %1564 = vmatmul.bf16.gmra.mxu1 %v1472_v17  ;;  %v1481_v50 = vunpack.c.l.bf16 %v1472_v17 }
 0x2ee   : > { %v1482_v7 = vunpack.c.h.bf16 %v1472_v17 }
 0x2ef   : > { %1950 = vpow2.f32 %v1459_v27  ;;  %v1427_v41 = vunpack.c.l.bf16 %v1417_v39  ;;  %v1428_v62 = vunpack.c.h.bf16 %v1417_v39  ;;  %1499 = vadd.xlane.f32.xlu1 %v1481_v50 }
 0x2f0   : > { %1952 = vpow2.f32 %v1461_v10 }
 0x2f1   : > { %v1447_v13 = vmul.f32 1.442695, %v1427_v41  ;;  %v1449_v40 = vmul.f32 1.442695, %v1428_v62 }
 0x2f2   : > { %v1380_v63 = vpop.xlane.xlu2 %1379 }
 0x2f3   : > { %1954 = vpow2.f32 %v1447_v13  ;;  %v1405_v23 = vsub.f32 %v2962_v45, %v1380_v63 }
 0x2f4   : > { %1956 = vpow2.f32 %v1449_v40 }
 0x2f5   : > { %v1951_v14 = vpop.eup %1950 }
 0x2f6   : > { %v1953_v24 = vpop.eup %1952 }
 0x2f7   : > { %v3045_v37 = vpack.c.bf16 %v1953_v24, %v1951_v14 }
 0x2f9   : > { %1584 = vmatmul.bf16.vlgmr.msra.gmra.mxu3 %v3045_v37  ;;  %v1955_v20 = vpop.eup %1954  ;;  %v1489_v21 = vunpack.c.l.bf16 %v3045_v37 }
 0x2fa   : > { %v1957_v3 = vpop.eup %1956 }
 0x2fb   : > { %v3048_v48 = vpack.c.bf16 %v1957_v3, %v1955_v20 }
 0x2fd   : > { %1569 = vmatmul.bf16.gmra.mxu1 %v3048_v48  ;;  %v1483_v9 = vunpack.c.l.bf16 %v3048_v48 }
 0x31e   : > { %v1392_v1 = vpop.xlane.xlu0 %1391 }
 0x31f   : > { %v1411_v49 = vsub.f32 %v3016_v58, %v1392_v1 }
 0x326   : > { %v1382_v46 = vpop.xlane.xlu0 %1381  ;;  %v1394_v18 = vpop.xlane.xlu1 %1393 }
 0x327   : > { %v1406_v25 = vsub.f32 %v2974_v15, %v1382_v46  ;;  %v1412_v52 = vsub.f32 %v3025_v11, %v1394_v18 }
 0x329   : > { %v1418_v59 = vpack.c.bf16 %v1406_v25, %v1405_v23  ;;  %v1421_v0 = vpack.c.bf16 %v1412_v52, %v1411_v49  ;;  %v1484_v52 = vunpack.c.h.bf16 %v3048_v48 }
 0x32b   : > { %v1429_v29 = vunpack.c.l.bf16 %v1418_v59  ;;  %v1430_v4 = vunpack.c.h.bf16 %v1418_v59  ;;  %v1435_v54 = vunpack.c.l.bf16 %v1421_v0  ;;  %v1436_v31 = vunpack.c.h.bf16 %v1421_v0 }
 0x32c   : > { %v1490_v0 = vunpack.c.h.bf16 %v3045_v37 }
 0x32d   : > { %v1451_v32 = vmul.f32 1.442695, %v1429_v29  ;;  %v1453_v28 = vmul.f32 1.442695, %v1430_v4  ;;  %v1463_v34 = vmul.f32 1.442695, %v1435_v54 }
 0x32e   : > { %v1465_v30 = vmul.f32 1.442695, %v1436_v31  ;;  %v1384_v35 = vpop.xlane.xlu0 %1383 }
 0x32f   : > { %1958 = vpow2.f32 %v1451_v32  ;;  %v1407_v55 = vsub.f32 %v2977_v19, %v1384_v35 }
 0x330   : > { %1960 = vpow2.f32 %v1453_v28 }
 0x331   : > { %1962 = vpow2.f32 %v1463_v34 }
 0x332   : > { %1964 = vpow2.f32 %v1465_v30 }
 0x335   : > { %v1959_v45 = vpop.eup %1958 }
 0x336   : > { %v1961_v58 = vpop.eup %1960 }
 0x337   : > { %v1963_v60 = vpop.eup %1962  ;;  %v1474_v15 = vpack.c.bf16 %v1961_v58, %v1959_v45 }
 0x338   : > { %v1965_v2 = vpop.eup %1964 }
 0x339   : > { %1574 = vmatmul.bf16.gmra.mxu1 %v1474_v15  ;;  %v3055_v11 = vpack.c.bf16 %v1965_v2, %v1963_v60  ;;  %v1486_v5 = vunpack.c.h.bf16 %v1474_v15  ;;  %v1485_v38 = vunpack.c.l.bf16 %v1474_v15 }
 0x33b   : > { %1589 = vmatmul.bf16.gmra.mxu3 %v3055_v11  ;;  %1509 = vadd.xlane.f32.xlu0 %v1486_v5  ;;  %v1492_v51 = vunpack.c.h.bf16 %v3055_v11  ;;  %v1491_v25 = vunpack.c.l.bf16 %v3055_v11 }
 0x33c   : > { %1507 = vadd.xlane.f32.xlu2 %v1485_v38 }
 0x343   : > { %1503 = vadd.xlane.f32.xlu0 %v1483_v9 }
 0x344   : > { %1501 = vadd.xlane.f32.xlu2 %v1482_v7 }
 0x346   : > { %v1396_v16 = vpop.xlane.xlu1 %1395 }
 0x347   : > { %v1413_v8 = vsub.f32 %v3032_v43, %v1396_v16 }
 0x348   : > { %v1498_v61 = vpop.xlane.xlu0 %1497 }
 0x349   : > { %1966 = vrcp.f32 %v1498_v61 }
 0x34b   : > { %1515 = vadd.xlane.f32.xlu0 %v1489_v21 }
 0x34e   : > { %v1398_v33 = vpop.xlane.xlu2 %1397  ;;  %v1386_v53 = vpop.xlane.xlu1 %1385 }
 0x34f   : > { %v1414_v57 = vsub.f32 %v3037_v26, %v1398_v33  ;;  %v1408_v12 = vsub.f32 %v2982_v56, %v1386_v53  ;;  %v1967_v26 = vpop.eup %1966 }
 0x350   : > { %v1560_v42 = vpop.f32.mrf.mxu1 }
 0x351   : > { %v1422_v22 = vpack.c.bf16 %v1414_v57, %v1413_v8  ;;  %v1419_v36 = vpack.c.bf16 %v1408_v12, %v1407_v55 }
 0x353   : > { %1521 = vadd.xlane.f32.xlu0 %v1492_v51  ;;  %v1437_v44 = vunpack.c.l.bf16 %v1422_v22  ;;  %v1438_v47 = vunpack.c.h.bf16 %v1422_v22  ;;  %v1431_v19 = vunpack.c.l.bf16 %v1419_v36  ;;  %v1432_v6 = vunpack.c.h.bf16 %v1419_v36 }
 0x355   : > { %v1467_v17 = vmul.f32 1.442695, %v1437_v44  ;;  %v1469_v27 = vmul.f32 1.442695, %v1438_v47  ;;  %v1455_v10 = vmul.f32 1.442695, %v1431_v19 }
 0x356   : > { %v1457_v43 = vmul.f32 1.442695, %v1432_v6  ;;  %v1496_v39 = vpop.xlane.xlu2 %1495 }
 0x357   : > { %1968 = vpow2.f32 %v1467_v17 }
 0x358   : > { %1970 = vpow2.f32 %v1469_v27  ;;  %v1562_v56 = vpop.f32.mrf.mxu1 }
 0x359   : > { %1972 = vpow2.f32 %v1455_v10  ;;  %v1617_v50 = vmul.f32 %v1967_v26, %v1562_v56 }
 0x35a   : > { %1974 = vpow2.f32 %v1457_v43 }
 0x35b   : > { %1634 = vst.msk [vmem:[%s3069_s17 + $0x8] sm:$0xff] %vm1632_vm0, %v1617_v50  ;;  %1976 = vrcp.f32 %v1496_v39 }
 0x35d   : > { %v1969_v41 = vpop.eup %1968 }
 0x35e   : > { %v1971_v62 = vpop.eup %1970 }
 0x35f   : > { %v1973_v13 = vpop.eup %1972  ;;  %v1478_v40 = vpack.c.bf16 %v1971_v62, %v1969_v41 }
 0x360   : > { %v1975_v14 = vpop.eup %1974 }
 0x361   : > { %v1977_v24 = vpop.eup %1976  ;;  %v1475_v3 = vpack.c.bf16 %v1975_v14, %v1973_v13  ;;  %1594 = vmatmul.bf16.gmra.mxu3 %v1478_v40  ;;  %v1494_v59 = vunpack.c.h.bf16 %v1478_v40  ;;  %v1493_v29 = vunpack.c.l.bf16 %v1478_v40 }
 0x362   : > { %v1500_v20 = vpop.xlane.xlu1 %1499  ;;  %v1616_v1 = vmul.f32 %v1977_v24, %v1560_v42 }
 0x363   : > { %1978 = vrcp.f32 %v1500_v20  ;;  %1579 = vmatmul.bf16.gmra.mxu1 %v1475_v3  ;;  %v1488_v63 = vunpack.c.h.bf16 %v1475_v3  ;;  %v1487_v46 = vunpack.c.l.bf16 %v1475_v3 }
 0x364   : > { %1633 = vst.msk [vmem:[%s3069_s17] sm:$0xff] %vm1632_vm0, %v1616_v1 }
 0x365   : > { %1513 = vadd.xlane.f32.xlu2 %v1488_v63  ;;  %1511 = vadd.xlane.f32.xlu1 %v1487_v46 }
 0x369   : > { %v1979_v18 = vpop.eup %1978 }
 0x36a   : > { %v1565_v23 = vpop.f32.mrf.mxu1 }
 0x36b   : > { %v1618_v49 = vmul.f32 %v1979_v18, %v1565_v23 }
 0x36d   : > { %1635 = vst.msk [vmem:[%s3069_s17 + $0x10] sm:$0xff] %vm1632_vm0, %v1618_v49  ;;  %1519 = vadd.xlane.f32.xlu2 %v1491_v25  ;;  %1505 = vadd.xlane.f32.xlu1 %v1484_v52 }
 0x372   : > { %v1567_v4 = vpop.f32.mrf.mxu1 }
 0x375   : > { %1525 = vadd.xlane.f32.xlu2 %v1494_v59  ;;  %1517 = vadd.xlane.f32.xlu1 %v1490_v0 }
 0x37a   : > { %v1570_v54 = vpop.f32.mrf.mxu1 }
 0x37c   : > { %v1585_v34 = vpop.f32.mrf.mxu3 }
 0x37d   : > { %1523 = vadd.xlane.f32.xlu1 %v1493_v29 }
 0x382   : > { %v1572_v31 = vpop.f32.mrf.mxu1 }
 0x384   : > { %v1587_v15 = vpop.f32.mrf.mxu3 }
 0x3ae   : > { %v1510_v32 = vpop.xlane.xlu0 %1509 }
 0x3af   : > { %v1508_v28 = vpop.xlane.xlu2 %1507 }
 0x3b0   : > { %1980 = vrcp.f32 %v1508_v28 }
 0x3b1   : > { %1982 = vrcp.f32 %v1510_v32 }
 0x3b6   : > { %v1981_v48 = vpop.eup %1980  ;;  %v1575_v30 = vpop.f32.mrf.mxu1 }
 0x3b7   : > { %v1504_v45 = vpop.xlane.xlu0 %1503  ;;  %v1502_v58 = vpop.xlane.xlu2 %1501  ;;  %v1622_v37 = vmul.f32 %v1981_v48, %v1575_v30 }
 0x3b8   : > { %1984 = vrcp.f32 %v1504_v45  ;;  %v1983_v60 = vpop.eup %1982 }
 0x3b9   : > { %1986 = vrcp.f32 %v1502_v58  ;;  %1639 = vst.msk [vmem:[%s3069_s17 + $0x30] sm:$0xff] %vm1632_vm0, %v1622_v37 }
 0x3be   : > { %v1985_v2 = vpop.eup %1984  ;;  %v1577_v38 = vpop.f32.mrf.mxu1 }
 0x3bf   : > { %v1987_v11 = vpop.eup %1986  ;;  %v1620_v5 = vmul.f32 %v1985_v2, %v1570_v54  ;;  %v1623_v7 = vmul.f32 %v1983_v60, %v1577_v38  ;;  %v1516_v16 = vpop.xlane.xlu0 %1515 }
 0x3c0   : > { %v1619_v9 = vmul.f32 %v1987_v11, %v1567_v4  ;;  %1988 = vrcp.f32 %v1516_v16  ;;  %v1590_v35 = vpop.f32.mrf.mxu3 }
 0x3c1   : > { %1637 = vst.msk [vmem:[%s3069_s17 + $0x20] sm:$0xff] %vm1632_vm0, %v1620_v5 }
 0x3c2   : > { %1636 = vst.msk [vmem:[%s3069_s17 + $0x18] sm:$0xff] %vm1632_vm0, %v1619_v9 }
 0x3c3   : > { %1640 = vst.msk [vmem:[%s3069_s17 + $0x38] sm:$0xff] %vm1632_vm0, %v1623_v7 }
 0x3c6   : > { %v1989_v21 = vpop.eup %1988 }
 0x3c7   : > { %v1626_v55 = vmul.f32 %v1989_v21, %v1585_v34  ;;  %v1522_v33 = vpop.xlane.xlu0 %1521 }
 0x3c8   : > { %1990 = vrcp.f32 %v1522_v33  ;;  %v1592_v61 = vpop.f32.mrf.mxu3 }
 0x3c9   : > { %1643 = vst.msk [vmem:[%s3069_s17 + $0x50] sm:$0xff] %vm1632_vm0, %v1626_v55 }
 0x3ce   : > { %v1991_v53 = vpop.eup %1990 }
 0x3cf   : > { %v1629_v8 = vmul.f32 %v1991_v53, %v1592_v61 }
 0x3d1   : > { %1646 = vst.msk [vmem:[%s3069_s17 + $0x68] sm:$0xff] %vm1632_vm0, %v1629_v8 }
 0x3d8   : > { %v1514_v57 = vpop.xlane.xlu2 %1513  ;;  %v1512_v12 = vpop.xlane.xlu1 %1511 }
 0x3d9   : > { %1992 = vrcp.f32 %v1512_v12 }
 0x3da   : > { %1994 = vrcp.f32 %v1514_v57 }
 0x3df   : > { %v1993_v51 = vpop.eup %1992 }
 0x3e0   : > { %v1580_v42 = vpop.f32.mrf.mxu1  ;;  %v1520_v22 = vpop.xlane.xlu2 %1519 }
 0x3e1   : > { %v1624_v36 = vmul.f32 %v1993_v51, %v1580_v42  ;;  %1996 = vrcp.f32 %v1520_v22  ;;  %v1506_v44 = vpop.xlane.xlu1 %1505  ;;  %v1995_v19 = vpop.eup %1994 }
 0x3e2   : > { %1998 = vrcp.f32 %v1506_v44 }
 0x3e3   : > { %1641 = vst.msk [vmem:[%s3069_s17 + $0x40] sm:$0xff] %vm1632_vm0, %v1624_v36 }
 0x3e4   : > { %v1595_v47 = vpop.f32.mrf.mxu3 }
 0x3e7   : > { %v1997_v6 = vpop.eup %1996 }
 0x3e8   : > { %v1999_v17 = vpop.eup %1998  ;;  %v1628_v27 = vmul.f32 %v1997_v6, %v1590_v35  ;;  %v1582_v10 = vpop.f32.mrf.mxu1 }
 0x3e9   : > { %v1526_v43 = vpop.xlane.xlu2 %1525  ;;  %v1621_v26 = vmul.f32 %v1999_v17, %v1572_v31  ;;  %v1625_v56 = vmul.f32 %v1995_v19, %v1582_v10  ;;  %v1518_v39 = vpop.xlane.xlu1 %1517 }
 0x3ea   : > { %2000 = vrcp.f32 %v1526_v43  ;;  %1645 = vst.msk [vmem:[%s3069_s17 + $0x60] sm:$0xff] %vm1632_vm0, %v1628_v27 }
 0x3eb   : > { %2002 = vrcp.f32 %v1518_v39  ;;  %1638 = vst.msk [vmem:[%s3069_s17 + $0x28] sm:$0xff] %vm1632_vm0, %v1621_v26 }
 0x3ec   : > { %1642 = vst.msk [vmem:[%s3069_s17 + $0x48] sm:$0xff] %vm1632_vm0, %v1625_v56  ;;  %v1597_v50 = vpop.f32.mrf.mxu3 }
 0x3f0   : > { %v2001_v41 = vpop.eup %2000 }
 0x3f1   : > { %v2003_v62 = vpop.eup %2002  ;;  %v1631_v13 = vmul.f32 %v2001_v41, %v1597_v50  ;;  %v1524_v14 = vpop.xlane.xlu1 %1523 }
 0x3f2   : > { %v1627_v40 = vmul.f32 %v2003_v62, %v1587_v15  ;;  %2004 = vrcp.f32 %v1524_v14 }
 0x3f3   : > { %1648 = vst.msk [vmem:[%s3069_s17 + $0x78] sm:$0xff] %vm1632_vm0, %v1631_v13 }
 0x3f4   : > { %1644 = vst.msk [vmem:[%s3069_s17 + $0x58] sm:$0xff] %vm1632_vm0, %v1627_v40 }
 0x3f8   : > { %v2005_v24 = vpop.eup %2004 }
 0x3f9   : > { %v1630_v20 = vmul.f32 %v2005_v24, %v1595_v47 }
 0x3fb   : > { %1647 = vst.msk [vmem:[%s3069_s17 + $0x70] sm:$0xff] %vm1632_vm0, %v1630_v20 }
 0x3fc PF: > { %s15_s20 = sadd.s32 1, %s2030_s20   ;;  %s3147_s18 = smov %s2026_s19 }
 0x3fd   : > { %p12_p5 = scmp.ge.s32.totalorder %s15_s20, 4   ;;  %s3148_s19 = smov %s3150_s21 }
 0x3ff   :  { %14 = sbr.rel (!%p12_p5) target bundleno = 2 (0x2), region = 80 }

</bundles_post_ra>
